<compile_context>
chip_gen: v5e
topology: v5e:2x2
jax: 0.10.0
libtpu: 0.0.40
codegen_flags: <defaults>
</compile_context>

<pallas_src>
import jax
import jax.numpy as jnp
from jax.experimental import pallas as pl
from jax.experimental.pallas import tpu as pltpu


# ---------------------------------------------------------------------------
# Fused forward kernel
# ---------------------------------------------------------------------------

def evi_fused_kernel(
    feat_ref,       # [B, D]              f32   flattened feature embedding
    s1_w_ref,       # [D, E*De + 2*E]     bf16  stage-1 experts || gates (fused RHS)
    s1_b_ref,       # [1, E*De + 2*E]     f32
    s2_w_ref,       # [5D, E*De + 1*E]    bf16  conversion experts || gate (fused RHS)
    s2_b_ref,       # [1, E*De + 1*E]     f32
    gexp_ref,       # [E, E*De]           f32   0/1: broadcast gate[:,e] over expert e's lanes
    feat_exp_ref,   # [D, 5D]             f32   0/1: column c -> feat[:, c//5]
    pe_tile_ref,    # [5, 5D]             f32   0/1: column c -> pe[:, c%5]
    pe_w_ref,       # [1, 5]              f32   pctr_embedding = nn.Linear(1, 5)
    pe_b_ref,       # [1, 5]              f32
    tw1_ref, tb1_ref,   # [3, De, T1] bf16 / [3, 1, T1] f32    tower layer 1
    tw2_ref, tb2_ref,   # [3, T1, T2] bf16 / [3, 1, T2] f32    tower layer 2
    tw3_ref, tb3_ref,   # [3, T2, T3] bf16 / [3, 1, T3] f32    tower layer 3
    twp_ref, tbp_ref,   # [3, T3, 1]  f32  / [3, 1, 1]  f32    prediction heads (tiny)
    task_ref,       # [3, B, De]          f32   mixed task features (output)
    slab_ref,       # [3, B, T1+T2+T3+1]  f32   per-tower [h1 | h2 | h3 | sigmoid(pred)]
):
  E = gexp_ref.shape[0]
  De = task_ref.shape[2]
  EDe = E * De
  T1 = tw1_ref.shape[2]
  T2 = tw2_ref.shape[2]
  T3 = tw3_ref.shape[2]

  feat = feat_ref[...]                     # [B, D] f32
  gexp = gexp_ref[...]                     # [E, E*De] f32 (loaded once)

  def mmoe(x, w_ref, b_ref, num_gates):
    """One wide matmul -> all experts + gate logits, then softmax + mixture."""
    y = jnp.dot(x.astype(jnp.bfloat16), w_ref[...],
                preferred_element_type=jnp.float32) + b_ref[...]
    experts = jnp.maximum(y[:, :EDe], 0.0)            # Linear -> BN(id) -> ReLU
    tasks = []
    for g in range(num_gates):
      logits = y[:, EDe + g * E: EDe + (g + 1) * E]   # [B, E]
      m = jnp.max(logits, axis=1, keepdims=True)
      ex = jnp.exp(logits - m)
      gate = ex * pl.reciprocal(jnp.sum(ex, axis=1, keepdims=True), approx=True)
      # torch.bmm(gate, fea): broadcast gate over each expert's De lanes with a
      # tiny 0/1 matmul (one MXU op per gate, no per-expert width-1 lane slices),
      # then reduce over lane-aligned De-wide expert groups.
      grep = jnp.dot(gate, gexp, preferred_element_type=jnp.float32)   # [B, E*De]
      mixed = grep * experts
      t = mixed[:, 0:De]
      for e in range(1, E):
        t = t + mixed[:, e * De:(e + 1) * De]
      tasks.append(t)
    return tasks

  def tower(x, i):
    """MlpLayerFea (3x Linear->BN(id)->ReLU->Dropout(id)) + sigmoid(Linear(.,1))."""
    h1 = jnp.maximum(
        jnp.dot(x.astype(jnp.bfloat16), tw1_ref[i],
                preferred_element_type=jnp.float32) + tb1_ref[i], 0.0)
    h2 = jnp.maximum(
        jnp.dot(h1.astype(jnp.bfloat16), tw2_ref[i],
                preferred_element_type=jnp.float32) + tb2_ref[i], 0.0)
    h3 = jnp.maximum(
        jnp.dot(h2.astype(jnp.bfloat16), tw3_ref[i],
                preferred_element_type=jnp.float32) + tb3_ref[i], 0.0)
    # Prediction head must see post-ReLU h3 (cannot be fused into w3).
    logit = jnp.dot(h3, twp_ref[i], preferred_element_type=jnp.float32) + tbp_ref[i]
    pred = pl.reciprocal(1.0 + jnp.exp(-logit), approx=True)     # sigmoid via EUP recip
    # Single per-tower output slab [h1 | h2 | h3 | pred]; widest chunk is lane-aligned.
    slab_ref[i, :, 0:T1] = h1
    slab_ref[i, :, T1:T1 + T2] = h2
    slab_ref[i, :, T1 + T2:T1 + T2 + T3] = h3
    slab_ref[i, :, T1 + T2 + T3:T1 + T2 + T3 + 1] = pred
    return pred

  # ---- stage 1: ctr / cvr ------------------------------------------------
  task0, task1 = mmoe(feat, s1_w_ref, s1_b_ref, 2)
  task_ref[0] = task0
  task_ref[1] = task1
  pctr = tower(task0, 0)                               # [B, 1]
  tower(task1, 1)

  # ---- pctr embedding (nn.Linear(1,5) on detached pctr) + outer product --
  pe = pctr * pe_w_ref[...] + pe_b_ref[...]            # [B, 5]
  # ait[:, i*5 + j] = feat[:, i] * pe[:, j]  (matches torch outer_product layout)
  ait = (jnp.dot(feat, feat_exp_ref[...], preferred_element_type=jnp.float32) *
         jnp.dot(pe, pe_tile_ref[...], preferred_element_type=jnp.float32))   # [B, 5D]

  # ---- stage 2: conversion ------------------------------------------------
  (task2,) = mmoe(ait, s2_w_ref, s2_b_ref, 1)
  task_ref[2] = task2
  tower(task2, 2)


# ---------------------------------------------------------------------------
# pallas_call wrapper (whole problem fits in VMEM at these sizes -> single block)
# ---------------------------------------------------------------------------

_VMEM = pl.BlockSpec(memory_space=pltpu.MemorySpace.VMEM)


def run_evi_kernel(feat, pk):
  B = feat.shape[0]
  De = pk["tw1"].shape[1]
  T1, T2, T3 = pk["tw1"].shape[2], pk["tw2"].shape[2], pk["tw3"].shape[2]
  S = T1 + T2 + T3 + 1
  # TODO(synk): at serving batch sizes (B >= 512) add a batch grid with ~256-512 row
  # blocks and dimension_semantics=("parallel",) so v7x uses both TensorCores and
  # DMA double-buffers behind the matmuls; unnecessary at B=8.
  return pl.pallas_call(
      evi_fused_kernel,
      out_shape=(jax.ShapeDtypeStruct((3, B, De), jnp.float32),
                 jax.ShapeDtypeStruct((3, B, S), jnp.float32)),
      in_specs=[_VMEM] * 18,
      out_specs=(_VMEM, _VMEM),
  )(feat, pk["s1_w"], pk["s1_b"], pk["s2_w"], pk["s2_b"], pk["gexp"],
    pk["feat_exp"], pk["pe_tile"], pk["pe_w"], pk["pe_b"],
    pk["tw1"], pk["tb1"], pk["tw2"], pk["tb2"], pk["tw3"], pk["tb3"],
    pk["twp"], pk["tbp"])


@jax.jit
def evi_forward(x_ids, embed_table, pk):
  """Evi.forward: embedding lookup (glue) + fused NewMmoeOuterProductLayerFea kernel."""
  B, F = x_ids.shape
  # TODO(synk): AlldataEmbeddingLayer not provided; approximated by per-field lookup.
  emb = embed_table[jnp.arange(F)[None, :], x_ids]               # [B, F, ED]
  feat = emb.reshape(B, -1).astype(jnp.float32)                  # [B, D]

  task_out, slab_out = run_evi_kernel(feat, pk)

  T1, T2, T3 = pk["tw1"].shape[2], pk["tw2"].shape[2], pk["tw3"].shape[2]
  results = [slab_out[i, :, T1 + T2 + T3] for i in range(3)]     # pctr, pcvr, pconversion
  task_fea = [task_out[i] for i in range(3)]
  tower_fea = [[slab_out[i, :, :T1],
                slab_out[i, :, T1:T1 + T2],
                slab_out[i, :, T1 + T2:T1 + T2 + T3]] for i in range(3)]
  return results, feat, task_fea, tower_fea


# ---------------------------------------------------------------------------
# Parameter init (PyTorch nn.Linear-style uniform(+-1/sqrt(fan_in))) and packing
# ---------------------------------------------------------------------------

def _lin(key, fan_in, shape):
  bound = float(fan_in) ** -0.5
  return jax.random.uniform(key, shape, jnp.float32, -bound, bound)


def init_params(key, *, num_fields, embed_dim, vocab, expert_num, expert_dim,
                tower_dims, task_num):
  """Per-module parameters; Linear weights stored input-major [in, out]."""
  D = num_fields * embed_dim
  E, De = expert_num, expert_dim
  T1, T2, T3 = tower_dims
  G = task_num - 1
  ctr = [0]

  def nk():
    ctr[0] += 1
    return jax.random.fold_in(key, ctr[0])

  p = {}
  p["embed_table"] = 0.1 * jax.random.normal(nk(), (num_fields, vocab, embed_dim),
                                             jnp.float32)
  # stage-1 experts (MultiLayerPerceptron) and gates
  p["expert_w"] = _lin(nk(), D, (E, D, De))
  p["expert_b"] = _lin(nk(), D, (E, De))
  p["gate_w"] = _lin(nk(), D, (G, D, E))
  p["gate_b"] = _lin(nk(), D, (G, E))
  # conversion experts / gate (input dim = 5*D)
  p["conv_expert_w"] = _lin(nk(), 5 * D, (E, 5 * D, De))
  p["conv_expert_b"] = _lin(nk(), 5 * D, (E, De))
  p["conv_gate_w"] = _lin(nk(), 5 * D, (1, 5 * D, E))
  p["conv_gate_b"] = _lin(nk(), 5 * D, (1, E))
  # towers (ctr, cvr, conversion): MlpLayerFea (3 layers) + Linear(T3, 1) head
  towers = []
  for _ in range(task_num):
    towers.append(dict(
        w1=_lin(nk(), De, (De, T1)), b1=_lin(nk(), De, (T1,)),
        w2=_lin(nk(), T1, (T1, T2)), b2=_lin(nk(), T1, (T2,)),
        w3=_lin(nk(), T2, (T2, T3)), b3=_lin(nk(), T2, (T3,)),
        wp=_lin(nk(), T3, (T3, 1)), bp=_lin(nk(), T3, (1,))))
  p["tower"] = towers
  # pctr_embedding = nn.Linear(1, 5)
  p["pctr_emb_w"] = _lin(nk(), 1, (5,))
  p["pctr_emb_b"] = _lin(nk(), 1, (5,))
  return p


def pack_params(p, weight_dtype=jnp.bfloat16):
  """One-time packing into the kernel layout: fuse expert+gate weights per MMoE stage,
  stack the 3 towers, build the 0/1 expand matrices, cast big weight stacks to bf16."""
  E, D, De = p["expert_w"].shape
  D5 = p["conv_expert_w"].shape[1]

  def fuse(ew, eb, gw, gb, din):
    w = jnp.concatenate([ew.transpose(1, 0, 2).reshape(din, -1),
                         gw.transpose(1, 0, 2).reshape(din, -1)], axis=1)
    b = jnp.concatenate([eb.reshape(1, -1), gb.reshape(1, -1)], axis=1)
    return w.astype(weight_dtype), b.astype(jnp.float32)

  pk = {}
  pk["s1_w"], pk["s1_b"] = fuse(p["expert_w"], p["expert_b"],
                                p["gate_w"], p["gate_b"], D)
  pk["s2_w"], pk["s2_b"] = fuse(p["conv_expert_w"], p["conv_expert_b"],
                                p["conv_gate_w"], p["conv_gate_b"], D5)
  # 0/1 expand matrices (exact in f32)
  pk["gexp"] = (jnp.arange(E * De)[None, :] // De
                == jnp.arange(E)[:, None]).astype(jnp.float32)         # [E, E*De]
  pk["feat_exp"] = (jnp.arange(5 * D)[None, :] // 5
                    == jnp.arange(D)[:, None]).astype(jnp.float32)     # [D, 5D]
  pk["pe_tile"] = (jnp.arange(5 * D)[None, :] % 5
                   == jnp.arange(5)[:, None]).astype(jnp.float32)      # [5, 5D]
  pk["pe_w"] = p["pctr_emb_w"].reshape(1, 5).astype(jnp.float32)
  pk["pe_b"] = p["pctr_emb_b"].reshape(1, 5).astype(jnp.float32)
  # towers stacked [3, ...]; big layers bf16, tiny prediction head kept f32
  t = p["tower"]
  pk["tw1"] = jnp.stack([ti["w1"] for ti in t]).astype(weight_dtype)
  pk["tb1"] = jnp.stack([ti["b1"][None, :] for ti in t])
  pk["tw2"] = jnp.stack([ti["w2"] for ti in t]).astype(weight_dtype)
  pk["tb2"] = jnp.stack([ti["b2"][None, :] for ti in t])
  pk["tw3"] = jnp.stack([ti["w3"] for ti in t]).astype(weight_dtype)
  pk["tb3"] = jnp.stack([ti["b3"][None, :] for ti in t])
  pk["twp"] = jnp.stack([ti["wp"] for ti in t]).astype(jnp.float32)
  pk["tbp"] = jnp.stack([ti["bp"][None, :] for ti in t])
  return pk


if __name__ == "__main__":
  # Small shapes consistent with the module: B=8, 4 fields x 8-dim embeddings -> D=32
  # (so 5*D=160 for the conversion stage), 4 experts of dim 128,
  # tower_dims=(128, 64, 32), task_num=3 (ctr, cvr, conversion).
  B, num_fields, embed_dim, vocab = 8, 4, 8, 100
  expert_num, expert_dim = 4, 128
  tower_dims = (128, 64, 32)
  task_num = 3

  key = jax.random.PRNGKey(0)
  params = init_params(key, num_fields=num_fields, embed_dim=embed_dim, vocab=vocab,
                       expert_num=expert_num, expert_dim=expert_dim,
                       tower_dims=tower_dims, task_num=task_num)
  packed = pack_params(params)

  x_ids = jax.random.randint(jax.random.fold_in(key, 999), (B, num_fields), 0, vocab)

  results, feature_embedding, task_fea, tower_fea = evi_forward(
      x_ids, params["embed_table"], packed)
  jax.block_until_ready((results, feature_embedding, task_fea, tower_fea))

  # sanity: shapes match the PyTorch module's outputs
  assert all(r.shape == (B,) for r in results)
  assert feature_embedding.shape == (B, num_fields * embed_dim)
  assert len(task_fea) == 3 and all(t.shape == (B, expert_dim) for t in task_fea)
  assert len(tower_fea) == 3
  assert [h.shape[1] for h in tower_fea[0]] == list(tower_dims)
  assert all(bool(jnp.all(jnp.isfinite(r))) for r in results)
  assert all(bool(jnp.all((r > -1e-3) & (r < 1.0 + 1e-3))) for r in results)

  print("KERNEL_OK")
</pallas_src>

<mosaic_0001>
module attributes {stable_mosaic.version = 11 : i64} {
  func.func @evi_fused_kernel(%arg0: memref<8x32xf32, #tpu.memory_space<vmem>>, %arg1: memref<32x520xbf16, #tpu.memory_space<vmem>>, %arg2: memref<1x520xf32, #tpu.memory_space<vmem>>, %arg3: memref<160x516xbf16, #tpu.memory_space<vmem>>, %arg4: memref<1x516xf32, #tpu.memory_space<vmem>>, %arg5: memref<4x512xf32, #tpu.memory_space<vmem>>, %arg6: memref<32x160xf32, #tpu.memory_space<vmem>>, %arg7: memref<5x160xf32, #tpu.memory_space<vmem>>, %arg8: memref<1x5xf32, #tpu.memory_space<vmem>>, %arg9: memref<1x5xf32, #tpu.memory_space<vmem>>, %arg10: memref<3x128x128xbf16, #tpu.memory_space<vmem>>, %arg11: memref<3x1x128xf32, #tpu.memory_space<vmem>>, %arg12: memref<3x128x64xbf16, #tpu.memory_space<vmem>>, %arg13: memref<3x1x64xf32, #tpu.memory_space<vmem>>, %arg14: memref<3x64x32xbf16, #tpu.memory_space<vmem>>, %arg15: memref<3x1x32xf32, #tpu.memory_space<vmem>>, %arg16: memref<3x32x1xf32, #tpu.memory_space<vmem>>, %arg17: memref<3x1x1xf32, #tpu.memory_space<vmem>>, %arg18: memref<3x8x128xf32, #tpu.memory_space<vmem>>, %arg19: memref<3x8x225xf32, #tpu.memory_space<vmem>>) attributes {dimension_semantics = [], scalar_prefetch = 0 : i64, scratch_operands = 0 : i64, tpu.core_type = #tpu.core_type<tc>} {
    %c0 = arith.constant 0 : index
    %c0_0 = arith.constant 0 : index
    %0 = vector.load %arg0[%c0, %c0_0] : memref<8x32xf32, #tpu.memory_space<vmem>>, vector<8x32xf32>
    %c0_1 = arith.constant 0 : index
    %c0_2 = arith.constant 0 : index
    %1 = vector.load %arg5[%c0_1, %c0_2] : memref<4x512xf32, #tpu.memory_space<vmem>>, vector<4x512xf32>
    %2 = arith.truncf %0 : vector<8x32xf32> to vector<8x32xbf16>
    %c0_3 = arith.constant 0 : index
    %c0_4 = arith.constant 0 : index
    %3 = vector.load %arg1[%c0_3, %c0_4] : memref<32x520xbf16, #tpu.memory_space<vmem>>, vector<32x520xbf16>
    %cst = arith.constant dense<0.000000e+00> : vector<8x520xf32>
    %4 = tpu.matmul %2, %3, %cst {dimension_numbers = #tpu.dot_dimension_numbers<[1], [0], [0], [1], [0, 0, 1, 1], [], []>} : vector<8x32xbf16>, vector<32x520xbf16>, vector<8x520xf32> -> vector<8x520xf32>
    %c0_5 = arith.constant 0 : index
    %c0_6 = arith.constant 0 : index
    %5 = vector.load %arg2[%c0_5, %c0_6] : memref<1x520xf32, #tpu.memory_space<vmem>>, vector<1x520xf32>
    %6 = vector.broadcast %5 : vector<1x520xf32> to vector<8x520xf32>
    %7 = arith.addf %4, %6 : vector<8x520xf32>
    %8 = vector.extract_strided_slice %7 {offsets = [0, 0], sizes = [8, 512], strides = [1, 1]} : vector<8x520xf32> to vector<8x512xf32>
    %cst_7 = arith.constant 0.000000e+00 : f32
    %9 = vector.broadcast %cst_7 : f32 to vector<8x512xf32>
    %10 = arith.maximumf %8, %9 : vector<8x512xf32>
    %11 = vector.extract_strided_slice %7 {offsets = [0, 512], sizes = [8, 4], strides = [1, 1]} : vector<8x520xf32> to vector<8x4xf32>
    %cst_8 = arith.constant dense<0xFF800000> : vector<8xf32>
    %12 = vector.multi_reduction <maximumf>, %11, %cst_8 [1] : vector<8x4xf32> to vector<8xf32>
    %13 = vector.shape_cast %12 : vector<8xf32> to vector<8x1xf32>
    %14 = vector.broadcast %13 : vector<8x1xf32> to vector<8x4xf32>
    %15 = arith.subf %11, %14 : vector<8x4xf32>
    %16 = math.exp %15 : vector<8x4xf32>
    %cst_9 = arith.constant dense<0.000000e+00> : vector<8xf32>
    %17 = vector.multi_reduction <add>, %16, %cst_9 [1] : vector<8x4xf32> to vector<8xf32>
    %18 = vector.shape_cast %17 : vector<8xf32> to vector<8x1xf32>
    %19 = tpu.reciprocal %18 {approx = true} : vector<8x1xf32> -> vector<8x1xf32>
    %20 = vector.broadcast %19 : vector<8x1xf32> to vector<8x4xf32>
    %21 = arith.mulf %16, %20 : vector<8x4xf32>
    %cst_10 = arith.constant dense<0.000000e+00> : vector<8x512xf32>
    %22 = tpu.matmul %21, %1, %cst_10 {dimension_numbers = #tpu.dot_dimension_numbers<[1], [0], [0], [1], [0, 0, 1, 1], [], []>} : vector<8x4xf32>, vector<4x512xf32>, vector<8x512xf32> -> vector<8x512xf32>
    %23 = arith.mulf %22, %10 : vector<8x512xf32>
    %24 = vector.extract_strided_slice %23 {offsets = [0, 0], sizes = [8, 128], strides = [1, 1]} : vector<8x512xf32> to vector<8x128xf32>
    %25 = vector.extract_strided_slice %23 {offsets = [0, 128], sizes = [8, 128], strides = [1, 1]} : vector<8x512xf32> to vector<8x128xf32>
    %26 = arith.addf %24, %25 : vector<8x128xf32>
    %27 = vector.extract_strided_slice %23 {offsets = [0, 256], sizes = [8, 128], strides = [1, 1]} : vector<8x512xf32> to vector<8x128xf32>
    %28 = arith.addf %26, %27 : vector<8x128xf32>
    %29 = vector.extract_strided_slice %23 {offsets = [0, 384], sizes = [8, 128], strides = [1, 1]} : vector<8x512xf32> to vector<8x128xf32>
    %30 = arith.addf %28, %29 : vector<8x128xf32>
    %31 = vector.extract_strided_slice %7 {offsets = [0, 516], sizes = [8, 4], strides = [1, 1]} : vector<8x520xf32> to vector<8x4xf32>
    %cst_11 = arith.constant dense<0xFF800000> : vector<8xf32>
    %32 = vector.multi_reduction <maximumf>, %31, %cst_11 [1] : vector<8x4xf32> to vector<8xf32>
    %33 = vector.shape_cast %32 : vector<8xf32> to vector<8x1xf32>
    %34 = vector.broadcast %33 : vector<8x1xf32> to vector<8x4xf32>
    %35 = arith.subf %31, %34 : vector<8x4xf32>
    %36 = math.exp %35 : vector<8x4xf32>
    %cst_12 = arith.constant dense<0.000000e+00> : vector<8xf32>
    %37 = vector.multi_reduction <add>, %36, %cst_12 [1] : vector<8x4xf32> to vector<8xf32>
    %38 = vector.shape_cast %37 : vector<8xf32> to vector<8x1xf32>
    %39 = tpu.reciprocal %38 {approx = true} : vector<8x1xf32> -> vector<8x1xf32>
    %40 = vector.broadcast %39 : vector<8x1xf32> to vector<8x4xf32>
    %41 = arith.mulf %36, %40 : vector<8x4xf32>
    %cst_13 = arith.constant dense<0.000000e+00> : vector<8x512xf32>
    %42 = tpu.matmul %41, %1, %cst_13 {dimension_numbers = #tpu.dot_dimension_numbers<[1], [0], [0], [1], [0, 0, 1, 1], [], []>} : vector<8x4xf32>, vector<4x512xf32>, vector<8x512xf32> -> vector<8x512xf32>
    %43 = arith.mulf %42, %10 : vector<8x512xf32>
    %44 = vector.extract_strided_slice %43 {offsets = [0, 0], sizes = [8, 128], strides = [1, 1]} : vector<8x512xf32> to vector<8x128xf32>
    %45 = vector.extract_strided_slice %43 {offsets = [0, 128], sizes = [8, 128], strides = [1, 1]} : vector<8x512xf32> to vector<8x128xf32>
    %46 = arith.addf %44, %45 : vector<8x128xf32>
    %47 = vector.extract_strided_slice %43 {offsets = [0, 256], sizes = [8, 128], strides = [1, 1]} : vector<8x512xf32> to vector<8x128xf32>
    %48 = arith.addf %46, %47 : vector<8x128xf32>
    %49 = vector.extract_strided_slice %43 {offsets = [0, 384], sizes = [8, 128], strides = [1, 1]} : vector<8x512xf32> to vector<8x128xf32>
    %50 = arith.addf %48, %49 : vector<8x128xf32>
    %c0_14 = arith.constant 0 : index
    %c0_15 = arith.constant 0 : index
    %c0_16 = arith.constant 0 : index
    %51 = vector.load %arg18[%c0_14, %c0_15, %c0_16] : memref<3x8x128xf32, #tpu.memory_space<vmem>>, vector<1x8x128xf32>
    %52 = vector.shape_cast %51 : vector<1x8x128xf32> to vector<8x128xf32>
    %53 = vector.shape_cast %30 : vector<8x128xf32> to vector<1x8x128xf32>
    tpu.vector_store %arg18[%c0_14, %c0_15, %c0_16], %53 {strides = array<i32>} : memref<3x8x128xf32, #tpu.memory_space<vmem>>, vector<1x8x128xf32>,
    %c1 = arith.constant 1 : index
    %c0_17 = arith.constant 0 : index
    %c0_18 = arith.constant 0 : index
    %54 = vector.load %arg18[%c1, %c0_17, %c0_18] : memref<3x8x128xf32, #tpu.memory_space<vmem>>, vector<1x8x128xf32>
    %55 = vector.shape_cast %54 : vector<1x8x128xf32> to vector<8x128xf32>
    %56 = vector.shape_cast %50 : vector<8x128xf32> to vector<1x8x128xf32>
    tpu.vector_store %arg18[%c1, %c0_17, %c0_18], %56 {strides = array<i32>} : memref<3x8x128xf32, #tpu.memory_space<vmem>>, vector<1x8x128xf32>,
    %57 = arith.truncf %30 : vector<8x128xf32> to vector<8x128xbf16>
    %c0_19 = arith.constant 0 : index
    %c0_20 = arith.constant 0 : index
    %c0_21 = arith.constant 0 : index
    %58 = vector.load %arg10[%c0_19, %c0_20, %c0_21] : memref<3x128x128xbf16, #tpu.memory_space<vmem>>, vector<1x128x128xbf16>
    %59 = vector.shape_cast %58 : vector<1x128x128xbf16> to vector<128x128xbf16>
    %cst_22 = arith.constant dense<0.000000e+00> : vector<8x128xf32>
    %60 = tpu.matmul %57, %59, %cst_22 {dimension_numbers = #tpu.dot_dimension_numbers<[1], [0], [0], [1], [0, 0, 1, 1], [], []>} : vector<8x128xbf16>, vector<128x128xbf16>, vector<8x128xf32> -> vector<8x128xf32>
    %c0_23 = arith.constant 0 : index
    %c0_24 = arith.constant 0 : index
    %c0_25 = arith.constant 0 : index
    %61 = vector.load %arg11[%c0_23, %c0_24, %c0_25] : memref<3x1x128xf32, #tpu.memory_space<vmem>>, vector<1x1x128xf32>
    %62 = vector.shape_cast %61 : vector<1x1x128xf32> to vector<1x128xf32>
    %63 = vector.broadcast %62 : vector<1x128xf32> to vector<8x128xf32>
    %64 = arith.addf %60, %63 : vector<8x128xf32>
    %cst_26 = arith.constant 0.000000e+00 : f32
    %65 = vector.broadcast %cst_26 : f32 to vector<8x128xf32>
    %66 = arith.maximumf %64, %65 : vector<8x128xf32>
    %67 = arith.truncf %66 : vector<8x128xf32> to vector<8x128xbf16>
    %c0_27 = arith.constant 0 : index
    %c0_28 = arith.constant 0 : index
    %c0_29 = arith.constant 0 : index
    %68 = vector.load %arg12[%c0_27, %c0_28, %c0_29] : memref<3x128x64xbf16, #tpu.memory_space<vmem>>, vector<1x128x64xbf16>
    %69 = vector.shape_cast %68 : vector<1x128x64xbf16> to vector<128x64xbf16>
    %cst_30 = arith.constant dense<0.000000e+00> : vector<8x64xf32>
    %70 = tpu.matmul %67, %69, %cst_30 {dimension_numbers = #tpu.dot_dimension_numbers<[1], [0], [0], [1], [0, 0, 1, 1], [], []>} : vector<8x128xbf16>, vector<128x64xbf16>, vector<8x64xf32> -> vector<8x64xf32>
    %c0_31 = arith.constant 0 : index
    %c0_32 = arith.constant 0 : index
    %c0_33 = arith.constant 0 : index
    %71 = vector.load %arg13[%c0_31, %c0_32, %c0_33] : memref<3x1x64xf32, #tpu.memory_space<vmem>>, vector<1x1x64xf32>
    %72 = vector.shape_cast %71 : vector<1x1x64xf32> to vector<1x64xf32>
    %73 = vector.broadcast %72 : vector<1x64xf32> to vector<8x64xf32>
    %74 = arith.addf %70, %73 : vector<8x64xf32>
    %cst_34 = arith.constant 0.000000e+00 : f32
    %75 = vector.broadcast %cst_34 : f32 to vector<8x64xf32>
    %76 = arith.maximumf %74, %75 : vector<8x64xf32>
    %77 = arith.truncf %76 : vector<8x64xf32> to vector<8x64xbf16>
    %c0_35 = arith.constant 0 : index
    %c0_36 = arith.constant 0 : index
    %c0_37 = arith.constant 0 : index
    %78 = vector.load %arg14[%c0_35, %c0_36, %c0_37] : memref<3x64x32xbf16, #tpu.memory_space<vmem>>, vector<1x64x32xbf16>
    %79 = vector.shape_cast %78 : vector<1x64x32xbf16> to vector<64x32xbf16>
    %cst_38 = arith.constant dense<0.000000e+00> : vector<8x32xf32>
    %80 = tpu.matmul %77, %79, %cst_38 {dimension_numbers = #tpu.dot_dimension_numbers<[1], [0], [0], [1], [0, 0, 1, 1], [], []>} : vector<8x64xbf16>, vector<64x32xbf16>, vector<8x32xf32> -> vector<8x32xf32>
    %c0_39 = arith.constant 0 : index
    %c0_40 = arith.constant 0 : index
    %c0_41 = arith.constant 0 : index
    %81 = vector.load %arg15[%c0_39, %c0_40, %c0_41] : memref<3x1x32xf32, #tpu.memory_space<vmem>>, vector<1x1x32xf32>
    %82 = vector.shape_cast %81 : vector<1x1x32xf32> to vector<1x32xf32>
    %83 = vector.broadcast %82 : vector<1x32xf32> to vector<8x32xf32>
    %84 = arith.addf %80, %83 : vector<8x32xf32>
    %cst_42 = arith.constant 0.000000e+00 : f32
    %85 = vector.broadcast %cst_42 : f32 to vector<8x32xf32>
    %86 = arith.maximumf %84, %85 : vector<8x32xf32>
    %c0_43 = arith.constant 0 : index
    %c0_44 = arith.constant 0 : index
    %c0_45 = arith.constant 0 : index
    %87 = vector.load %arg16[%c0_43, %c0_44, %c0_45] : memref<3x32x1xf32, #tpu.memory_space<vmem>>, vector<1x32x1xf32>
    %88 = vector.shape_cast %87 : vector<1x32x1xf32> to vector<32x1xf32>
    %cst_46 = arith.constant dense<0.000000e+00> : vector<8x1xf32>
    %89 = tpu.matmul %86, %88, %cst_46 {dimension_numbers = #tpu.dot_dimension_numbers<[1], [0], [0], [1], [0, 0, 1, 1], [], []>} : vector<8x32xf32>, vector<32x1xf32>, vector<8x1xf32> -> vector<8x1xf32>
    %c0_47 = arith.constant 0 : index
    %c0_48 = arith.constant 0 : index
    %c0_49 = arith.constant 0 : index
    %90 = vector.load %arg17[%c0_47, %c0_48, %c0_49] : memref<3x1x1xf32, #tpu.memory_space<vmem>>, vector<1x1x1xf32>
    %91 = vector.shape_cast %90 : vector<1x1x1xf32> to vector<1x1xf32>
    %92 = vector.broadcast %91 : vector<1x1xf32> to vector<8x1xf32>
    %93 = arith.addf %89, %92 : vector<8x1xf32>
    %cst_50 = arith.constant 0.000000e+00 : f32
    %94 = vector.broadcast %cst_50 : f32 to vector<8x1xf32>
    %95 = arith.subf %94, %93 : vector<8x1xf32>
    %96 = math.exp %95 : vector<8x1xf32>
    %cst_51 = arith.constant 1.000000e+00 : f32
    %97 = vector.broadcast %cst_51 : f32 to vector<8x1xf32>
    %98 = arith.addf %97, %96 : vector<8x1xf32>
    %99 = tpu.reciprocal %98 {approx = true} : vector<8x1xf32> -> vector<8x1xf32>
    %c0_52 = arith.constant 0 : index
    %c0_53 = arith.constant 0 : index
    %c0_54 = arith.constant 0 : index
    %100 = vector.load %arg19[%c0_52, %c0_53, %c0_54] : memref<3x8x225xf32, #tpu.memory_space<vmem>>, vector<1x8x128xf32>
    %101 = vector.shape_cast %100 : vector<1x8x128xf32> to vector<8x128xf32>
    %102 = vector.shape_cast %66 : vector<8x128xf32> to vector<1x8x128xf32>
    tpu.vector_store %arg19[%c0_52, %c0_53, %c0_54], %102 {strides = array<i32>} : memref<3x8x225xf32, #tpu.memory_space<vmem>>, vector<1x8x128xf32>,
    %c0_55 = arith.constant 0 : index
    %c0_56 = arith.constant 0 : index
    %c128 = arith.constant 128 : index
    %103 = vector.load %arg19[%c0_55, %c0_56, %c128] : memref<3x8x225xf32, #tpu.memory_space<vmem>>, vector<1x8x64xf32>
    %104 = vector.shape_cast %103 : vector<1x8x64xf32> to vector<8x64xf32>
    %105 = vector.shape_cast %76 : vector<8x64xf32> to vector<1x8x64xf32>
    tpu.vector_store %arg19[%c0_55, %c0_56, %c128], %105 {strides = array<i32>} : memref<3x8x225xf32, #tpu.memory_space<vmem>>, vector<1x8x64xf32>,
    %c0_57 = arith.constant 0 : index
    %c0_58 = arith.constant 0 : index
    %c192 = arith.constant 192 : index
    %106 = vector.load %arg19[%c0_57, %c0_58, %c192] : memref<3x8x225xf32, #tpu.memory_space<vmem>>, vector<1x8x32xf32>
    %107 = vector.shape_cast %106 : vector<1x8x32xf32> to vector<8x32xf32>
    %108 = vector.shape_cast %86 : vector<8x32xf32> to vector<1x8x32xf32>
    tpu.vector_store %arg19[%c0_57, %c0_58, %c192], %108 {strides = array<i32>} : memref<3x8x225xf32, #tpu.memory_space<vmem>>, vector<1x8x32xf32>,
    %c0_59 = arith.constant 0 : index
    %c0_60 = arith.constant 0 : index
    %c224 = arith.constant 224 : index
    %109 = vector.load %arg19[%c0_59, %c0_60, %c224] : memref<3x8x225xf32, #tpu.memory_space<vmem>>, vector<1x8x1xf32>
    %110 = vector.shape_cast %109 : vector<1x8x1xf32> to vector<8x1xf32>
    %111 = vector.shape_cast %99 : vector<8x1xf32> to vector<1x8x1xf32>
    tpu.vector_store %arg19[%c0_59, %c0_60, %c224], %111 {strides = array<i32>} : memref<3x8x225xf32, #tpu.memory_space<vmem>>, vector<1x8x1xf32>,
    %112 = arith.truncf %50 : vector<8x128xf32> to vector<8x128xbf16>
    %c1_61 = arith.constant 1 : index
    %c0_62 = arith.constant 0 : index
    %c0_63 = arith.constant 0 : index
    %113 = vector.load %arg10[%c1_61, %c0_62, %c0_63] : memref<3x128x128xbf16, #tpu.memory_space<vmem>>, vector<1x128x128xbf16>
    %114 = vector.shape_cast %113 : vector<1x128x128xbf16> to vector<128x128xbf16>
    %cst_64 = arith.constant dense<0.000000e+00> : vector<8x128xf32>
    %115 = tpu.matmul %112, %114, %cst_64 {dimension_numbers = #tpu.dot_dimension_numbers<[1], [0], [0], [1], [0, 0, 1, 1], [], []>} : vector<8x128xbf16>, vector<128x128xbf16>, vector<8x128xf32> -> vector<8x128xf32>
    %c1_65 = arith.constant 1 : index
    %c0_66 = arith.constant 0 : index
    %c0_67 = arith.constant 0 : index
    %116 = vector.load %arg11[%c1_65, %c0_66, %c0_67] : memref<3x1x128xf32, #tpu.memory_space<vmem>>, vector<1x1x128xf32>
    %117 = vector.shape_cast %116 : vector<1x1x128xf32> to vector<1x128xf32>
    %118 = vector.broadcast %117 : vector<1x128xf32> to vector<8x128xf32>
    %119 = arith.addf %115, %118 : vector<8x128xf32>
    %cst_68 = arith.constant 0.000000e+00 : f32
    %120 = vector.broadcast %cst_68 : f32 to vector<8x128xf32>
    %121 = arith.maximumf %119, %120 : vector<8x128xf32>
    %122 = arith.truncf %121 : vector<8x128xf32> to vector<8x128xbf16>
    %c1_69 = arith.constant 1 : index
    %c0_70 = arith.constant 0 : index
    %c0_71 = arith.constant 0 : index
    %123 = vector.load %arg12[%c1_69, %c0_70, %c0_71] : memref<3x128x64xbf16, #tpu.memory_space<vmem>>, vector<1x128x64xbf16>
    %124 = vector.shape_cast %123 : vector<1x128x64xbf16> to vector<128x64xbf16>
    %cst_72 = arith.constant dense<0.000000e+00> : vector<8x64xf32>
    %125 = tpu.matmul %122, %124, %cst_72 {dimension_numbers = #tpu.dot_dimension_numbers<[1], [0], [0], [1], [0, 0, 1, 1], [], []>} : vector<8x128xbf16>, vector<128x64xbf16>, vector<8x64xf32> -> vector<8x64xf32>
    %c1_73 = arith.constant 1 : index
    %c0_74 = arith.constant 0 : index
    %c0_75 = arith.constant 0 : index
    %126 = vector.load %arg13[%c1_73, %c0_74, %c0_75] : memref<3x1x64xf32, #tpu.memory_space<vmem>>, vector<1x1x64xf32>
    %127 = vector.shape_cast %126 : vector<1x1x64xf32> to vector<1x64xf32>
    %128 = vector.broadcast %127 : vector<1x64xf32> to vector<8x64xf32>
    %129 = arith.addf %125, %128 : vector<8x64xf32>
    %cst_76 = arith.constant 0.000000e+00 : f32
    %130 = vector.broadcast %cst_76 : f32 to vector<8x64xf32>
    %131 = arith.maximumf %129, %130 : vector<8x64xf32>
    %132 = arith.truncf %131 : vector<8x64xf32> to vector<8x64xbf16>
    %c1_77 = arith.constant 1 : index
    %c0_78 = arith.constant 0 : index
    %c0_79 = arith.constant 0 : index
    %133 = vector.load %arg14[%c1_77, %c0_78, %c0_79] : memref<3x64x32xbf16, #tpu.memory_space<vmem>>, vector<1x64x32xbf16>
    %134 = vector.shape_cast %133 : vector<1x64x32xbf16> to vector<64x32xbf16>
    %cst_80 = arith.constant dense<0.000000e+00> : vector<8x32xf32>
    %135 = tpu.matmul %132, %134, %cst_80 {dimension_numbers = #tpu.dot_dimension_numbers<[1], [0], [0], [1], [0, 0, 1, 1], [], []>} : vector<8x64xbf16>, vector<64x32xbf16>, vector<8x32xf32> -> vector<8x32xf32>
    %c1_81 = arith.constant 1 : index
    %c0_82 = arith.constant 0 : index
    %c0_83 = arith.constant 0 : index
    %136 = vector.load %arg15[%c1_81, %c0_82, %c0_83] : memref<3x1x32xf32, #tpu.memory_space<vmem>>, vector<1x1x32xf32>
    %137 = vector.shape_cast %136 : vector<1x1x32xf32> to vector<1x32xf32>
    %138 = vector.broadcast %137 : vector<1x32xf32> to vector<8x32xf32>
    %139 = arith.addf %135, %138 : vector<8x32xf32>
    %cst_84 = arith.constant 0.000000e+00 : f32
    %140 = vector.broadcast %cst_84 : f32 to vector<8x32xf32>
    %141 = arith.maximumf %139, %140 : vector<8x32xf32>
    %c1_85 = arith.constant 1 : index
    %c0_86 = arith.constant 0 : index
    %c0_87 = arith.constant 0 : index
    %142 = vector.load %arg16[%c1_85, %c0_86, %c0_87] : memref<3x32x1xf32, #tpu.memory_space<vmem>>, vector<1x32x1xf32>
    %143 = vector.shape_cast %142 : vector<1x32x1xf32> to vector<32x1xf32>
    %cst_88 = arith.constant dense<0.000000e+00> : vector<8x1xf32>
    %144 = tpu.matmul %141, %143, %cst_88 {dimension_numbers = #tpu.dot_dimension_numbers<[1], [0], [0], [1], [0, 0, 1, 1], [], []>} : vector<8x32xf32>, vector<32x1xf32>, vector<8x1xf32> -> vector<8x1xf32>
    %c1_89 = arith.constant 1 : index
    %c0_90 = arith.constant 0 : index
    %c0_91 = arith.constant 0 : index
    %145 = vector.load %arg17[%c1_89, %c0_90, %c0_91] : memref<3x1x1xf32, #tpu.memory_space<vmem>>, vector<1x1x1xf32>
    %146 = vector.shape_cast %145 : vector<1x1x1xf32> to vector<1x1xf32>
    %147 = vector.broadcast %146 : vector<1x1xf32> to vector<8x1xf32>
    %148 = arith.addf %144, %147 : vector<8x1xf32>
    %cst_92 = arith.constant 0.000000e+00 : f32
    %149 = vector.broadcast %cst_92 : f32 to vector<8x1xf32>
    %150 = arith.subf %149, %148 : vector<8x1xf32>
    %151 = math.exp %150 : vector<8x1xf32>
    %cst_93 = arith.constant 1.000000e+00 : f32
    %152 = vector.broadcast %cst_93 : f32 to vector<8x1xf32>
    %153 = arith.addf %152, %151 : vector<8x1xf32>
    %154 = tpu.reciprocal %153 {approx = true} : vector<8x1xf32> -> vector<8x1xf32>
    %c1_94 = arith.constant 1 : index
    %c0_95 = arith.constant 0 : index
    %c0_96 = arith.constant 0 : index
    %155 = vector.load %arg19[%c1_94, %c0_95, %c0_96] : memref<3x8x225xf32, #tpu.memory_space<vmem>>, vector<1x8x128xf32>
    %156 = vector.shape_cast %155 : vector<1x8x128xf32> to vector<8x128xf32>
    %157 = vector.shape_cast %121 : vector<8x128xf32> to vector<1x8x128xf32>
    tpu.vector_store %arg19[%c1_94, %c0_95, %c0_96], %157 {strides = array<i32>} : memref<3x8x225xf32, #tpu.memory_space<vmem>>, vector<1x8x128xf32>,
    %c1_97 = arith.constant 1 : index
    %c0_98 = arith.constant 0 : index
    %c128_99 = arith.constant 128 : index
    %158 = vector.load %arg19[%c1_97, %c0_98, %c128_99] : memref<3x8x225xf32, #tpu.memory_space<vmem>>, vector<1x8x64xf32>
    %159 = vector.shape_cast %158 : vector<1x8x64xf32> to vector<8x64xf32>
    %160 = vector.shape_cast %131 : vector<8x64xf32> to vector<1x8x64xf32>
    tpu.vector_store %arg19[%c1_97, %c0_98, %c128_99], %160 {strides = array<i32>} : memref<3x8x225xf32, #tpu.memory_space<vmem>>, vector<1x8x64xf32>,
    %c1_100 = arith.constant 1 : index
    %c0_101 = arith.constant 0 : index
    %c192_102 = arith.constant 192 : index
    %161 = vector.load %arg19[%c1_100, %c0_101, %c192_102] : memref<3x8x225xf32, #tpu.memory_space<vmem>>, vector<1x8x32xf32>
    %162 = vector.shape_cast %161 : vector<1x8x32xf32> to vector<8x32xf32>
    %163 = vector.shape_cast %141 : vector<8x32xf32> to vector<1x8x32xf32>
    tpu.vector_store %arg19[%c1_100, %c0_101, %c192_102], %163 {strides = array<i32>} : memref<3x8x225xf32, #tpu.memory_space<vmem>>, vector<1x8x32xf32>,
    %c1_103 = arith.constant 1 : index
    %c0_104 = arith.constant 0 : index
    %c224_105 = arith.constant 224 : index
    %164 = vector.load %arg19[%c1_103, %c0_104, %c224_105] : memref<3x8x225xf32, #tpu.memory_space<vmem>>, vector<1x8x1xf32>
    %165 = vector.shape_cast %164 : vector<1x8x1xf32> to vector<8x1xf32>
    %166 = vector.shape_cast %154 : vector<8x1xf32> to vector<1x8x1xf32>
    tpu.vector_store %arg19[%c1_103, %c0_104, %c224_105], %166 {strides = array<i32>} : memref<3x8x225xf32, #tpu.memory_space<vmem>>, vector<1x8x1xf32>,
    %c0_106 = arith.constant 0 : index
    %c0_107 = arith.constant 0 : index
    %167 = vector.load %arg8[%c0_106, %c0_107] : memref<1x5xf32, #tpu.memory_space<vmem>>, vector<1x5xf32>
    %168 = vector.broadcast %99 : vector<8x1xf32> to vector<8x5xf32>
    %169 = vector.broadcast %167 : vector<1x5xf32> to vector<8x5xf32>
    %170 = arith.mulf %168, %169 : vector<8x5xf32>
    %c0_108 = arith.constant 0 : index
    %c0_109 = arith.constant 0 : index
    %171 = vector.load %arg9[%c0_108, %c0_109] : memref<1x5xf32, #tpu.memory_space<vmem>>, vector<1x5xf32>
    %172 = vector.broadcast %171 : vector<1x5xf32> to vector<8x5xf32>
    %173 = arith.addf %170, %172 : vector<8x5xf32>
    %c0_110 = arith.constant 0 : index
    %c0_111 = arith.constant 0 : index
    %174 = vector.load %arg6[%c0_110, %c0_111] : memref<32x160xf32, #tpu.memory_space<vmem>>, vector<32x160xf32>
    %cst_112 = arith.constant dense<0.000000e+00> : vector<8x160xf32>
    %175 = tpu.matmul %0, %174, %cst_112 {dimension_numbers = #tpu.dot_dimension_numbers<[1], [0], [0], [1], [0, 0, 1, 1], [], []>} : vector<8x32xf32>, vector<32x160xf32>, vector<8x160xf32> -> vector<8x160xf32>
    %c0_113 = arith.constant 0 : index
    %c0_114 = arith.constant 0 : index
    %176 = vector.load %arg7[%c0_113, %c0_114] : memref<5x160xf32, #tpu.memory_space<vmem>>, vector<5x160xf32>
    %cst_115 = arith.constant dense<0.000000e+00> : vector<8x160xf32>
    %177 = tpu.matmul %173, %176, %cst_115 {dimension_numbers = #tpu.dot_dimension_numbers<[1], [0], [0], [1], [0, 0, 1, 1], [], []>} : vector<8x5xf32>, vector<5x160xf32>, vector<8x160xf32> -> vector<8x160xf32>
    %178 = arith.mulf %175, %177 : vector<8x160xf32>
    %179 = arith.truncf %178 : vector<8x160xf32> to vector<8x160xbf16>
    %c0_116 = arith.constant 0 : index
    %c0_117 = arith.constant 0 : index
    %180 = vector.load %arg3[%c0_116, %c0_117] : memref<160x516xbf16, #tpu.memory_space<vmem>>, vector<160x516xbf16>
    %cst_118 = arith.constant dense<0.000000e+00> : vector<8x516xf32>
    %181 = tpu.matmul %179, %180, %cst_118 {dimension_numbers = #tpu.dot_dimension_numbers<[1], [0], [0], [1], [0, 0, 1, 1], [], []>} : vector<8x160xbf16>, vector<160x516xbf16>, vector<8x516xf32> -> vector<8x516xf32>
    %c0_119 = arith.constant 0 : index
    %c0_120 = arith.constant 0 : index
    %182 = vector.load %arg4[%c0_119, %c0_120] : memref<1x516xf32, #tpu.memory_space<vmem>>, vector<1x516xf32>
    %183 = vector.broadcast %182 : vector<1x516xf32> to vector<8x516xf32>
    %184 = arith.addf %181, %183 : vector<8x516xf32>
    %185 = vector.extract_strided_slice %184 {offsets = [0, 0], sizes = [8, 512], strides = [1, 1]} : vector<8x516xf32> to vector<8x512xf32>
    %cst_121 = arith.constant 0.000000e+00 : f32
    %186 = vector.broadcast %cst_121 : f32 to vector<8x512xf32>
    %187 = arith.maximumf %185, %186 : vector<8x512xf32>
    %188 = vector.extract_strided_slice %184 {offsets = [0, 512], sizes = [8, 4], strides = [1, 1]} : vector<8x516xf32> to vector<8x4xf32>
    %cst_122 = arith.constant dense<0xFF800000> : vector<8xf32>
    %189 = vector.multi_reduction <maximumf>, %188, %cst_122 [1] : vector<8x4xf32> to vector<8xf32>
    %190 = vector.shape_cast %189 : vector<8xf32> to vector<8x1xf32>
    %191 = vector.broadcast %190 : vector<8x1xf32> to vector<8x4xf32>
    %192 = arith.subf %188, %191 : vector<8x4xf32>
    %193 = math.exp %192 : vector<8x4xf32>
    %cst_123 = arith.constant dense<0.000000e+00> : vector<8xf32>
    %194 = vector.multi_reduction <add>, %193, %cst_123 [1] : vector<8x4xf32> to vector<8xf32>
    %195 = vector.shape_cast %194 : vector<8xf32> to vector<8x1xf32>
    %196 = tpu.reciprocal %195 {approx = true} : vector<8x1xf32> -> vector<8x1xf32>
    %197 = vector.broadcast %196 : vector<8x1xf32> to vector<8x4xf32>
    %198 = arith.mulf %193, %197 : vector<8x4xf32>
    %cst_124 = arith.constant dense<0.000000e+00> : vector<8x512xf32>
    %199 = tpu.matmul %198, %1, %cst_124 {dimension_numbers = #tpu.dot_dimension_numbers<[1], [0], [0], [1], [0, 0, 1, 1], [], []>} : vector<8x4xf32>, vector<4x512xf32>, vector<8x512xf32> -> vector<8x512xf32>
    %200 = arith.mulf %199, %187 : vector<8x512xf32>
    %201 = vector.extract_strided_slice %200 {offsets = [0, 0], sizes = [8, 128], strides = [1, 1]} : vector<8x512xf32> to vector<8x128xf32>
    %202 = vector.extract_strided_slice %200 {offsets = [0, 128], sizes = [8, 128], strides = [1, 1]} : vector<8x512xf32> to vector<8x128xf32>
    %203 = arith.addf %201, %202 : vector<8x128xf32>
    %204 = vector.extract_strided_slice %200 {offsets = [0, 256], sizes = [8, 128], strides = [1, 1]} : vector<8x512xf32> to vector<8x128xf32>
    %205 = arith.addf %203, %204 : vector<8x128xf32>
    %206 = vector.extract_strided_slice %200 {offsets = [0, 384], sizes = [8, 128], strides = [1, 1]} : vector<8x512xf32> to vector<8x128xf32>
    %207 = arith.addf %205, %206 : vector<8x128xf32>
    %c2 = arith.constant 2 : index
    %c0_125 = arith.constant 0 : index
    %c0_126 = arith.constant 0 : index
    %208 = vector.load %arg18[%c2, %c0_125, %c0_126] : memref<3x8x128xf32, #tpu.memory_space<vmem>>, vector<1x8x128xf32>
    %209 = vector.shape_cast %208 : vector<1x8x128xf32> to vector<8x128xf32>
    %210 = vector.shape_cast %207 : vector<8x128xf32> to vector<1x8x128xf32>
    tpu.vector_store %arg18[%c2, %c0_125, %c0_126], %210 {strides = array<i32>} : memref<3x8x128xf32, #tpu.memory_space<vmem>>, vector<1x8x128xf32>,
    %211 = arith.truncf %207 : vector<8x128xf32> to vector<8x128xbf16>
    %c2_127 = arith.constant 2 : index
    %c0_128 = arith.constant 0 : index
    %c0_129 = arith.constant 0 : index
    %212 = vector.load %arg10[%c2_127, %c0_128, %c0_129] : memref<3x128x128xbf16, #tpu.memory_space<vmem>>, vector<1x128x128xbf16>
    %213 = vector.shape_cast %212 : vector<1x128x128xbf16> to vector<128x128xbf16>
    %cst_130 = arith.constant dense<0.000000e+00> : vector<8x128xf32>
    %214 = tpu.matmul %211, %213, %cst_130 {dimension_numbers = #tpu.dot_dimension_numbers<[1], [0], [0], [1], [0, 0, 1, 1], [], []>} : vector<8x128xbf16>, vector<128x128xbf16>, vector<8x128xf32> -> vector<8x128xf32>
    %c2_131 = arith.constant 2 : index
    %c0_132 = arith.constant 0 : index
    %c0_133 = arith.constant 0 : index
    %215 = vector.load %arg11[%c2_131, %c0_132, %c0_133] : memref<3x1x128xf32, #tpu.memory_space<vmem>>, vector<1x1x128xf32>
    %216 = vector.shape_cast %215 : vector<1x1x128xf32> to vector<1x128xf32>
    %217 = vector.broadcast %216 : vector<1x128xf32> to vector<8x128xf32>
    %218 = arith.addf %214, %217 : vector<8x128xf32>
    %cst_134 = arith.constant 0.000000e+00 : f32
    %219 = vector.broadcast %cst_134 : f32 to vector<8x128xf32>
    %220 = arith.maximumf %218, %219 : vector<8x128xf32>
    %221 = arith.truncf %220 : vector<8x128xf32> to vector<8x128xbf16>
    %c2_135 = arith.constant 2 : index
    %c0_136 = arith.constant 0 : index
    %c0_137 = arith.constant 0 : index
    %222 = vector.load %arg12[%c2_135, %c0_136, %c0_137] : memref<3x128x64xbf16, #tpu.memory_space<vmem>>, vector<1x128x64xbf16>
    %223 = vector.shape_cast %222 : vector<1x128x64xbf16> to vector<128x64xbf16>
    %cst_138 = arith.constant dense<0.000000e+00> : vector<8x64xf32>
    %224 = tpu.matmul %221, %223, %cst_138 {dimension_numbers = #tpu.dot_dimension_numbers<[1], [0], [0], [1], [0, 0, 1, 1], [], []>} : vector<8x128xbf16>, vector<128x64xbf16>, vector<8x64xf32> -> vector<8x64xf32>
    %c2_139 = arith.constant 2 : index
    %c0_140 = arith.constant 0 : index
    %c0_141 = arith.constant 0 : index
    %225 = vector.load %arg13[%c2_139, %c0_140, %c0_141] : memref<3x1x64xf32, #tpu.memory_space<vmem>>, vector<1x1x64xf32>
    %226 = vector.shape_cast %225 : vector<1x1x64xf32> to vector<1x64xf32>
    %227 = vector.broadcast %226 : vector<1x64xf32> to vector<8x64xf32>
    %228 = arith.addf %224, %227 : vector<8x64xf32>
    %cst_142 = arith.constant 0.000000e+00 : f32
    %229 = vector.broadcast %cst_142 : f32 to vector<8x64xf32>
    %230 = arith.maximumf %228, %229 : vector<8x64xf32>
    %231 = arith.truncf %230 : vector<8x64xf32> to vector<8x64xbf16>
    %c2_143 = arith.constant 2 : index
    %c0_144 = arith.constant 0 : index
    %c0_145 = arith.constant 0 : index
    %232 = vector.load %arg14[%c2_143, %c0_144, %c0_145] : memref<3x64x32xbf16, #tpu.memory_space<vmem>>, vector<1x64x32xbf16>
    %233 = vector.shape_cast %232 : vector<1x64x32xbf16> to vector<64x32xbf16>
    %cst_146 = arith.constant dense<0.000000e+00> : vector<8x32xf32>
    %234 = tpu.matmul %231, %233, %cst_146 {dimension_numbers = #tpu.dot_dimension_numbers<[1], [0], [0], [1], [0, 0, 1, 1], [], []>} : vector<8x64xbf16>, vector<64x32xbf16>, vector<8x32xf32> -> vector<8x32xf32>
    %c2_147 = arith.constant 2 : index
    %c0_148 = arith.constant 0 : index
    %c0_149 = arith.constant 0 : index
    %235 = vector.load %arg15[%c2_147, %c0_148, %c0_149] : memref<3x1x32xf32, #tpu.memory_space<vmem>>, vector<1x1x32xf32>
    %236 = vector.shape_cast %235 : vector<1x1x32xf32> to vector<1x32xf32>
    %237 = vector.broadcast %236 : vector<1x32xf32> to vector<8x32xf32>
    %238 = arith.addf %234, %237 : vector<8x32xf32>
    %cst_150 = arith.constant 0.000000e+00 : f32
    %239 = vector.broadcast %cst_150 : f32 to vector<8x32xf32>
    %240 = arith.maximumf %238, %239 : vector<8x32xf32>
    %c2_151 = arith.constant 2 : index
    %c0_152 = arith.constant 0 : index
    %c0_153 = arith.constant 0 : index
    %241 = vector.load %arg16[%c2_151, %c0_152, %c0_153] : memref<3x32x1xf32, #tpu.memory_space<vmem>>, vector<1x32x1xf32>
    %242 = vector.shape_cast %241 : vector<1x32x1xf32> to vector<32x1xf32>
    %cst_154 = arith.constant dense<0.000000e+00> : vector<8x1xf32>
    %243 = tpu.matmul %240, %242, %cst_154 {dimension_numbers = #tpu.dot_dimension_numbers<[1], [0], [0], [1], [0, 0, 1, 1], [], []>} : vector<8x32xf32>, vector<32x1xf32>, vector<8x1xf32> -> vector<8x1xf32>
    %c2_155 = arith.constant 2 : index
    %c0_156 = arith.constant 0 : index
    %c0_157 = arith.constant 0 : index
    %244 = vector.load %arg17[%c2_155, %c0_156, %c0_157] : memref<3x1x1xf32, #tpu.memory_space<vmem>>, vector<1x1x1xf32>
    %245 = vector.shape_cast %244 : vector<1x1x1xf32> to vector<1x1xf32>
    %246 = vector.broadcast %245 : vector<1x1xf32> to vector<8x1xf32>
    %247 = arith.addf %243, %246 : vector<8x1xf32>
    %cst_158 = arith.constant 0.000000e+00 : f32
    %248 = vector.broadcast %cst_158 : f32 to vector<8x1xf32>
    %249 = arith.subf %248, %247 : vector<8x1xf32>
    %250 = math.exp %249 : vector<8x1xf32>
    %cst_159 = arith.constant 1.000000e+00 : f32
    %251 = vector.broadcast %cst_159 : f32 to vector<8x1xf32>
    %252 = arith.addf %251, %250 : vector<8x1xf32>
    %253 = tpu.reciprocal %252 {approx = true} : vector<8x1xf32> -> vector<8x1xf32>
    %c2_160 = arith.constant 2 : index
    %c0_161 = arith.constant 0 : index
    %c0_162 = arith.constant 0 : index
    %254 = vector.load %arg19[%c2_160, %c0_161, %c0_162] : memref<3x8x225xf32, #tpu.memory_space<vmem>>, vector<1x8x128xf32>
    %255 = vector.shape_cast %254 : vector<1x8x128xf32> to vector<8x128xf32>
    %256 = vector.shape_cast %220 : vector<8x128xf32> to vector<1x8x128xf32>
    tpu.vector_store %arg19[%c2_160, %c0_161, %c0_162], %256 {strides = array<i32>} : memref<3x8x225xf32, #tpu.memory_space<vmem>>, vector<1x8x128xf32>,
    %c2_163 = arith.constant 2 : index
    %c0_164 = arith.constant 0 : index
    %c128_165 = arith.constant 128 : index
    %257 = vector.load %arg19[%c2_163, %c0_164, %c128_165] : memref<3x8x225xf32, #tpu.memory_space<vmem>>, vector<1x8x64xf32>
    %258 = vector.shape_cast %257 : vector<1x8x64xf32> to vector<8x64xf32>
    %259 = vector.shape_cast %230 : vector<8x64xf32> to vector<1x8x64xf32>
    tpu.vector_store %arg19[%c2_163, %c0_164, %c128_165], %259 {strides = array<i32>} : memref<3x8x225xf32, #tpu.memory_space<vmem>>, vector<1x8x64xf32>,
    %c2_166 = arith.constant 2 : index
    %c0_167 = arith.constant 0 : index
    %c192_168 = arith.constant 192 : index
    %260 = vector.load %arg19[%c2_166, %c0_167, %c192_168] : memref<3x8x225xf32, #tpu.memory_space<vmem>>, vector<1x8x32xf32>
    %261 = vector.shape_cast %260 : vector<1x8x32xf32> to vector<8x32xf32>
    %262 = vector.shape_cast %240 : vector<8x32xf32> to vector<1x8x32xf32>
    tpu.vector_store %arg19[%c2_166, %c0_167, %c192_168], %262 {strides = array<i32>} : memref<3x8x225xf32, #tpu.memory_space<vmem>>, vector<1x8x32xf32>,
    %c2_169 = arith.constant 2 : index
    %c0_170 = arith.constant 0 : index
    %c224_171 = arith.constant 224 : index
    %263 = vector.load %arg19[%c2_169, %c0_170, %c224_171] : memref<3x8x225xf32, #tpu.memory_space<vmem>>, vector<1x8x1xf32>
    %264 = vector.shape_cast %263 : vector<1x8x1xf32> to vector<8x1xf32>
    %265 = vector.shape_cast %253 : vector<8x1xf32> to vector<1x8x1xf32>
    tpu.vector_store %arg19[%c2_169, %c0_170, %c224_171], %265 {strides = array<i32>} : memref<3x8x225xf32, #tpu.memory_space<vmem>>, vector<1x8x1xf32>,
    return
  }
}

</mosaic_0001>

<bundles_post_ra>
// kernel: evi_forward.1
= control target key start
LH: loop header
LB: loop body
LE: loop exit
PB: predicated region body
PF: predicated region fallthrough
CT: control target
= control target key end

     0   :  { %vm142_vm0 = vcmask 261120   ;;  %vm335_vm1 = vcmask 64544   ;;  %vm215_vm2 = vcmask 31744   ;;  %s2795_s26 = smov 124   ;;  %vm239_vm3 = vcmask 1043456   ;;  %s2797_s21 = smov 64   ;;  %s3744_s1 = inlined_call_operand.vmem [shape: bf16[32,520], index: 1, kind: input, shape index: {}]   ;;  %s3745_s0 = inlined_call_operand.vmem [shape: f32[8,32], index: 0, kind: input, shape index: {}]   ;;  %s3746_s2 = inlined_call_operand.vmem [shape: f32[1,520], index: 2, kind: input, shape index: {}]   ;;  %s3747_s5 = inlined_call_operand.vmem [shape: f32[4,512], index: 5, kind: input, shape index: {}]   ;;  %s3748_s10 = inlined_call_operand.vmem [shape: bf16[3,128,128], index: 10, kind: input, shape index: {}]   ;;  %s3749_s18 = inlined_call_operand.vmem [shape: f32[3,8,128], index: 18, kind: output, shape index: {0}]   ;;  %s3750_s12 = inlined_call_operand.vmem [shape: bf16[3,128,64], index: 12, kind: input, shape index: {}]   ;;  %s3751_s11 = inlined_call_operand.vmem [shape: f32[3,1,128], index: 11, kind: input, shape index: {}]   ;;  %s3752_s13 = inlined_call_operand.vmem [shape: f32[3,1,64], index: 13, kind: input, shape index: {}]   ;;  %s3753_s14 = inlined_call_operand.vmem [shape: bf16[3,64,32], index: 14, kind: input, shape index: {}]   ;;  %s3754_s19 = inlined_call_operand.vmem [shape: f32[3,8,225], index: 19, kind: output, shape index: {1}]   ;;  %s3755_s15 = inlined_call_operand.vmem [shape: f32[3,1,32], index: 15, kind: input, shape index: {}]   ;;  %s3756_s16 = inlined_call_operand.vmem [shape: f32[3,32,1], index: 16, kind: input, shape index: {}]   ;;  %s3757_s17 = inlined_call_operand.vmem [shape: f32[3,1,1], index: 17, kind: input, shape index: {}]   ;;  %s3758_s8 = inlined_call_operand.vmem [shape: f32[1,5], index: 8, kind: input, shape index: {}]   ;;  %s3759_s9 = inlined_call_operand.vmem [shape: f32[1,5], index: 9, kind: input, shape index: {}]   ;;  %s3760_s6 = inlined_call_operand.vmem [shape: f32[32,160], index: 6, kind: input, shape index: {}]   ;;  %s3761_s7 = inlined_call_operand.vmem [shape: f32[5,160], index: 7, kind: input, shape index: {}]   ;;  %s3762_s3 = inlined_call_operand.vmem [shape: bf16[160,516], index: 3, kind: input, shape index: {}]   ;;  %s3763_s4 = inlined_call_operand.vmem [shape: f32[1,516], index: 4, kind: input, shape index: {}]  }
   0x1   :  { %3766 = sst [smem:[#allocation2_spill]] %s3744_s1  ;;  %vm664_vm4 = vcmask 523264   ;;  %vm1078_vm5 = vcmask 1044480   ;;  %vm1074_vm6 = vcmask 39936   ;;  %vm723_vm7 = vcmask 785920  }
   0x2   :  { %3767 = sst [smem:[#allocation3_spill]] %s3745_s0  ;;  %vm729_vm8 = vcmask 794368  }
   0x3   :  { %3768 = sst [smem:[#allocation4_spill]] %s3746_s2 }
   0x4   :  { %3769 = sst [smem:[#allocation5_spill]] %s3747_s5 }
   0x5   :  { %s3770_s20 = sld [smem:[#allocation2_spill]] }
   0x6   :  { %s3771_s1 = sld [smem:[#allocation3_spill]] }
   0x7   :  { %s3772_s24 = sld [smem:[#allocation4_spill]] }
   0x8   :  { %s3773_s29 = sld [smem:[#allocation5_spill]] }
   0xb   :  { %v2022_v0 = vld [vmem:[%s3770_s20 + $0x28] sm:$0xf]  ;;  %v2639_v1 = vld [vmem:[%s3770_s20 + $0x38] sm:$0xf0]  ;;  %v2002_v2 = vld [vmem:[%s3770_s20] sm:$0xf] }
   0xc   :  { %v2023_v3 = vor.u32 %v2639_v1, %v2022_v0  ;;  %v2634_v4 = vld [vmem:[%s3770_s20 + $0x10] sm:$0xf0]  ;;  %v2038_v5 = vld [vmem:[%s3770_s20 + $0x38] sm:$0xf]  ;;  %v2641_v6 = vld [vmem:[%s3770_s20 + $0x48] sm:$0xf0] }
   0xd   :  { %v2003_v7 = vor.u32 %v2634_v4, %v2002_v2  ;;  %v2920_v8 = vld [vmem:[%s3771_s1] sm:$0xff]  ;;  %v2039_v9 = vor.u32 %v2641_v6, %v2038_v5  ;;  %v2018_v10 = vld [vmem:[%s3770_s20 + $0x10] sm:$0xf]  ;;  %v2637_v23 = vld [vmem:[%s3770_s20 + $0x2c] sm:$0xf] }
   0xe   :  { %152 = vmatpush.bf16.msra.mxu0 %v2023_v3  ;;  %v2636_v11 = vld [vmem:[%s3770_s20 + $0x20] sm:$0xf0]  ;;  %v2930_v12 = vpack.c.bf16 %v2920_v8, %v2920_v8  ;;  %v2024_v24 = vld [vmem:[%s3770_s20 + $0x3c] sm:$0xf0]  ;;  %v2030_v25 = vld [vmem:[%s3770_s20 + $0x30] sm:$0xf] }
   0xf   :  { %v2019_v13 = vor.u32 %v2636_v11, %v2018_v10  ;;  %v2941_v16 = vld [vmem:[%s3772_s24] sm:$0x1f]  ;;  %v2027_v26 = vor.u32 %v2637_v23, %v2024_v24  ;;  %v2004_v29 = vld [vmem:[%s3770_s20 + $0x14] sm:$0xf0]  ;;  %v2010_v31 = vld [vmem:[%s3770_s20 + $0x8] sm:$0xf] }
  0x10   :  { %v84_v17 = vperm.slane %v2941_v16, 4  ;;  %v2640_v27 = vld [vmem:[%s3770_s20 + $0x40] sm:$0xf0]  ;;  %v2635_v32 = vld [vmem:[%s3770_s20 + $0x18] sm:$0xf0]  ;;  %v2987_v47 = vld [vmem:[%s3773_s29 + $0x8] sm:$0xff] }
  0x11   :  { %v2632_v28 = vld [vmem:[%s3770_s20 + $0x4] sm:$0xf]  ;;  %v2031_v30 = vor.u32 %v2640_v27, %v2030_v25  ;;  %165 = vmatpush.bf16.msra.mxu1 %v2027_v26  ;;  %v2011_v34 = vor.u32 %v2635_v32, %v2010_v31  ;;  %v2638_v45 = vld [vmem:[%s3770_s20 + $0x34] sm:$0xf]  ;;  %v2032_v46 = vld [vmem:[%s3770_s20 + $0x44] sm:$0xf0] }
  0x12   :  { %153 = vmatpush.bf16.msra.mxu0 %v2003_v7  ;;  %v2007_v33 = vor.u32 %v2632_v28, %v2004_v29  ;;  %v63_v44 = vld [vmem:[%s3773_s29] sm:$0xff]  ;;  %v2035_v48 = vor.u32 %v2638_v45, %v2032_v46  ;;  %231 = vst [vmem:[#allocation1 + $0x10] ss:$2 sm:$0xff] %v2987_v47  ;;  %v2633_v51 = vld [vmem:[%s3770_s20 + $0xc] sm:$0xf]  ;;  %v2649_v7 = vld [vmem:[%s3748_s10 + $0x38] sm:$0xff] }
  0x13   :  { %178 = vmatpush.bf16.msra.mxu2 %v2031_v30  ;;  %229 = vst [vmem:[#allocation1] ss:$2 sm:$0xff] %v63_v44  ;;  %v2012_v52 = vld [vmem:[%s3770_s20 + $0x1c] sm:$0xf0]  ;;  %v83_v25 = vperm.slane %v2941_v16, 3  ;;  %v2644_v27 = vld [vmem:[%s3748_s10 + $0x10] sm:$0xff] }
  0x14   :  { %191 = vmatpush.bf16.msra.mxu3 %v2035_v48  ;;  %v2015_v53 = vor.u32 %v2633_v51, %v2012_v52  ;;  %v2653_v48 = vld [vmem:[%s3750_s12 + $0x18] sm:$0xff]  ;;  %v2650_v51 = vld [vmem:[%s3750_s12] sm:$0xff] }
  0x15   :  { %2040 = vmatmul.msk.bf16.vlgmr.msra.gmra.mxu0 %vm142_vm0, %v2930_v12  ;;  %166 = vmatpush.bf16.msra.mxu1 %v2007_v33  ;;  %v2661_v52 = vld [vmem:[%s3753_s14 + $0x18] sm:$0xff] }
  0x16   :  { %204 = vmatpush.bf16.msrb.mxu0 %v2039_v9  ;;  %v2648_v9 = vld [vmem:[%s3748_s10 + $0x30] sm:$0xff] }
  0x17   :  { %179 = vmatpush.bf16.msra.mxu2 %v2011_v34 }
  0x18   :  { %2041 = vmatmul.msk.bf16.vlgmr.msra.gmra.mxu1 %vm142_vm0, %v2930_v12  ;;  %192 = vmatpush.bf16.msra.mxu3 %v2015_v53  ;;  %v2660_v53 = vld [vmem:[%s3753_s14 + $0x10] sm:$0xff] }
  0x19   :  { %v234_v54 = vld.sshfl [vmem:[#allocation1 + $0x10] sm:$0xff pattern:$0x75316420]  ;;  %v235_v55 = vld.sshfl [vmem:[#allocation1 + $0x18] sm:$0xff pattern:$0x75316420] }
  0x1a   :  { %205 = vmatpush.bf16.msrb.mxu0 %v2019_v13  ;;  %2042 = vmatmul.msk.bf16.vlgmr.msra.gmra.mxu2 %vm142_vm0, %v2930_v12  ;;  %v232_v49 = vld.sshfl [vmem:[#allocation1] sm:$0xff pattern:$0x75316420]  ;;  %v233_v50 = vld.sshfl [vmem:[#allocation1 + $0x8] sm:$0xff pattern:$0x75316420] }
  0x1b   :  { %2045 = vmatpush.msk.msrb.mxu1 %vm239_vm3, %v232_v49  ;;  %2047 = vmatpush.msk.msrb.mxu2 %vm239_vm3, %v233_v50  ;;  %354 = vst [vmem:[#allocation1] ss:$2 sm:$0xff] %v63_v44  ;;  %v81_v13 = vperm.slane %v2941_v16, 1  ;;  %v2652_v49 = vld [vmem:[%s3750_s12 + $0x10] sm:$0xff]  ;;  %v2651_v50 = vld [vmem:[%s3750_s12 + $0x8] sm:$0xff] }
  0x1c   :  { %2043 = vmatmul.msk.bf16.vlgmr.msra.gmra.mxu3 %vm142_vm0, %v2930_v12  ;;  %356 = vst [vmem:[#allocation1 + $0x10] ss:$2 sm:$0xff] %v2987_v47 }
  0x1d   :  { %2049 = vmatpush.msk.msra.mxu1 %vm239_vm3, %v234_v54 }
  0x22   :  { %v357_v6 = vld.sshfl [vmem:[#allocation1] sm:$0xff pattern:$0x75316420]  ;;  %v358_v10 = vld.sshfl [vmem:[#allocation1 + $0x8] sm:$0xff pattern:$0x75316420] }
  0x23   :  { %2053 = vmatpush.msk.msra.mxu2 %vm239_vm3, %v357_v6  ;;  %2055 = vmatpush.msk.msrb.mxu3 %vm239_vm3, %v358_v10  ;;  %1609 = vst [vmem:[#allocation1] ss:$2 sm:$0xff] %v63_v44  ;;  %v359_v11 = vld.sshfl [vmem:[#allocation1 + $0x10] sm:$0xff pattern:$0x75316420]  ;;  %v2655_v44 = vld [vmem:[%s3750_s12 + $0x28] sm:$0xff] }
  0x24   :  { %2057 = vmatpush.msk.msra.mxu0 %vm239_vm3, %v359_v11  ;;  %v685_v10 = vld [vmem:[%s3756_s16 + $0x18] sm:$0xff]  ;;  %v684_v11 = vld [vmem:[%s3756_s16 + $0x10] sm:$0xff] }
  0x25   :  { %2044 = vmatmul.msk.bf16.vlgmr.msrb.gmra.mxu0 %vm142_vm0, %v2930_v12  ;;  %v2647_v12 = vld [vmem:[%s3748_s10 + $0x28] sm:$0xff] }
  0x26   :  { %672 = vmatpush.bf16.msrb.mxu0 %v2661_v52  ;;  %v1022_v52 = vld [vmem:[%s3760_s6 + $0x8] sm:$0xff] }
  0x2a   :  { %673 = vmatpush.bf16.msrb.mxu0 %v2660_v53 }
  0x92   :  { %v2936_v14 = vpop.f32.mrf.mxu0 }
  0x95   :  { %v168_v61 = vpop.f32.mrf.mxu1 }
  0x9a   :  { %v157_v15 = vpop.f32.mrf.mxu0 }
  0x9b   :  { %v2646_v15 = vld [vmem:[%s3748_s10 + $0x20] sm:$0xff] }
  0x9d   :  { %v181_v62 = vpop.f32.mrf.mxu2  ;;  %v170_v63 = vpop.f32.mrf.mxu1 }
  0x9f   :  { %v194_v2 = vpop.f32.mrf.mxu3 }
  0xa0   :  { %v195_v31 = vadd.f32 %v194_v2, %v83_v25 }
  0xa2   :  { %v207_v18 = vpop.f32.mrf.mxu0 }
  0xa3   :  { %v208_v19 = vadd.f32 %v207_v18, %v84_v17  ;;  %v80_v18 = vperm.slane %v2941_v16, 0 }
  0xa5   :  { %v336_v20 = vsel %vm335_vm1, %v208_v19, -inf  ;;  %v216_v21 = vsel %vm215_vm2, %v208_v19, -inf  ;;  %v183_v0 = vpop.f32.mrf.mxu2 }
  0xa6   :  { %337 = vmax.xlane.f32.xlu1 %v336_v20  ;;  %217 = vmax.xlane.f32.xlu0 %v216_v21  ;;  %v82_v20 = vperm.slane %v2941_v16, 2  ;;  %v2645_v21 = vld [vmem:[%s3748_s10 + $0x18] sm:$0xff]  ;;  %v214_v16 = vmax.f32 %v195_v31, 0.0  ;;  %v2757_v0 = vld [vmem:[%s3751_s11] ss:$0 sm:$0xff]  ;;  %v2675_v31 = vld [vmem:[%s3750_s12 + $0x68] sm:$0xff] }
  0xa7   :  { %v196_v5 = vpop.f32.mrf.mxu3 }
  0xa8   :  { %v3036_v24 = vadd.f32 %v181_v62, %v82_v20  ;;  %v2665_v20 = vld [vmem:[%s3748_s10 + $0x58] sm:$0xff] }
  0xaa   :  { %v209_v22 = vpop.f32.mrf.mxu0  ;;  %v213_v30 = vmax.f32 %v3036_v24, 0.0 }
  0xab   :  { %v3033_v22 = vadd.f32 %v2936_v14, %v80_v18  ;;  %v2667_v18 = vld [vmem:[%s3748_s10 + $0x68] sm:$0xff] }
  0xad   :  { %v211_v29 = vmax.f32 %v3033_v22, 0.0 }
 0x119   :  { %v338_v35 = vpop.xlane.xlu1 %337  ;;  %v218_v36 = vpop.xlane.xlu0 %217 }
 0x11a   :  { %v339_v37 = vsub.f32 %v208_v19, %v338_v35  ;;  %v219_v38 = vsub.f32 %v208_v19, %v218_v36  ;;  %v3026_v19 = vadd.f32 %v168_v61, %v81_v13  ;;  %v682_v13 = vld [vmem:[%s3756_s16] sm:$0xff] }
 0x11c   :  { %v340_v39 = vmul.f32 1.442695, %v339_v37  ;;  %v220_v40 = vmul.f32 1.442695, %v219_v38  ;;  %v212_v23 = vmax.f32 %v3026_v19, 0.0  ;;  %v2666_v19 = vld [vmem:[%s3748_s10 + $0x60] sm:$0xff] }
 0x11e   :  { %2771 = vpow2.f32 %v340_v39  ;;  %v360_v39 = vld.sshfl [vmem:[#allocation1 + $0x18] sm:$0xff pattern:$0x75316420] }
 0x11f   :  { %2773 = vpow2.f32 %v220_v40  ;;  %1611 = vst [vmem:[#allocation1 + $0x10] ss:$2 sm:$0xff] %v2987_v47  ;;  %v2643_v40 = vld [vmem:[%s3748_s10 + $0x8] sm:$0xff]  ;;  %v2654_v47 = vld [vmem:[%s3750_s12 + $0x20] sm:$0xff] }
 0x124   :  { %v2772_v41 = vpop.eup %2771 }
 0x125   :  { %v2774_v42 = vpop.eup %2773  ;;  %343 = vrot.lane.b32.xlu1 %v2772_v41, %s2795_s26 }
 0x126   :  { %v222_v43 = vsel %vm215_vm2, %v2774_v42, 0.0 }
 0x127   :  { %223 = vadd.xlane.f32.xlu0 %v222_v43  ;;  %v2656_v43 = vld [vmem:[%s3750_s12 + $0x30] sm:$0xff] }
 0x197   :  { %v344_v56 = vpop.permute.xlu1 %343 }
 0x198   :  { %v346_v57 = vsel %vm215_vm2, %v344_v56, 0.0 }
 0x199   :  { %347 = vadd.xlane.f32.xlu2 %v346_v57 }
 0x19a   :  { %v224_v58 = vpop.xlane.xlu0 %223 }
 0x19b   :  { %2775 = vrcp.f32 %v224_v58 }
 0x1a1   :  { %v2776_v59 = vpop.eup %2775 }
 0x1a2   :  { %v226_v60 = vmul.f32 %v2776_v59, %v2774_v42  ;;  %v2657_v42 = vld [vmem:[%s3750_s12 + $0x38] sm:$0xff] }
 0x1a3   :  { %613 = vmatpush.bf16.msra.mxu3 %v2657_v42  ;;  %v2796_v42 = vmov 0  }
 0x1a4   :  { %2046 = vmatmul.msk.f32.vlgmr.msrb.gmra.mxu1 %vm215_vm2, %v226_v60  ;;  %2048 = vmatmul.msk.f32.vlgmr.msrb.gmra.mxu2 %vm215_vm2, %v226_v60 }
 0x1a5   :  { %2051 = vmatpush.msk.msrb.mxu1 %vm239_vm3, %v235_v55  ;;  %530 = vmatpush.bf16.msrb.mxu2 %v2649_v7  ;;  %v2659_v7 = vld [vmem:[%s3753_s14 + $0x8] sm:$0xff] }
 0x1a6   :  { %674 = vmatpush.bf16.msrb.mxu0 %v2659_v7  ;;  %2756 = vset.pattern.permute.xlu0 %v2796_v42  ;;  %v2366_v42 = vld [vmem:[%s3762_s3 + $0xa0] sm:$0xf] }
 0x1a7   :  { %614 = vmatpush.bf16.msra.mxu3 %v2656_v43  ;;  %v2760_v43 = vld [vmem:[%s3757_s17] ss:$0 sm:$0xff] }
 0x1a9   :  { %531 = vmatpush.bf16.msrb.mxu2 %v2648_v9  ;;  %v2658_v9 = vld [vmem:[%s3753_s14] sm:$0xff] }
 0x1aa   :  { %675 = vmatpush.bf16.msrb.mxu0 %v2658_v9 }
 0x1ab   :  { %615 = vmatpush.bf16.msra.mxu3 %v2655_v44  ;;  %v1028_v44 = vld [vmem:[%s3760_s6 + $0x38] sm:$0xff] }
 0x1ac   :  { %2050 = vmatmul.msk.f32.vlgmr.msra.gmra.mxu1 %vm215_vm2, %v226_v60 }
 0x1ad   :  { %532 = vmatpush.bf16.msrb.mxu2 %v2647_v12  ;;  %2059 = vmatpush.msk.msra.mxu1 %vm239_vm3, %v360_v39  ;;  %v683_v12 = vld [vmem:[%s3756_s16 + $0x8] sm:$0xff]  ;;  %v2672_v39 = vld [vmem:[%s3750_s12 + $0x50] sm:$0xff] }
 0x1af   :  { %616 = vmatpush.bf16.msra.mxu3 %v2654_v47 }
 0x1b1   :  { %533 = vmatpush.bf16.msrb.mxu2 %v2646_v15  ;;  %v2669_v15 = vld [vmem:[%s3748_s10 + $0x78] sm:$0xff] }
 0x1b3   :  { %617 = vmatpush.bf16.msra.mxu3 %v2653_v48 }
 0x1b4   :  { %2052 = vmatmul.msk.f32.vlgmr.msrb.gmra.mxu1 %vm215_vm2, %v226_v60 }
 0x1b5   :  { %534 = vmatpush.bf16.msrb.mxu2 %v2645_v21  ;;  %705 = vmatpush.msrb.mxu1 %v685_v10  ;;  %v2758_v21 = vld [vmem:[%s3752_s13] ss:$0 sm:$0xff] }
 0x1b7   :  { %618 = vmatpush.bf16.msra.mxu3 %v2652_v49  ;;  %706 = vmatpush.msrb.mxu1 %v684_v11  ;;  %v1024_v49 = vld [vmem:[%s3760_s6 + $0x18] sm:$0xff] }
 0x1b9   :  { %535 = vmatpush.bf16.msrb.mxu2 %v2644_v27  ;;  %707 = vmatpush.msrb.mxu1 %v683_v12  ;;  %v2664_v27 = vld [vmem:[%s3748_s10 + $0x50] sm:$0xff] }
 0x1bb   :  { %619 = vmatpush.bf16.msra.mxu3 %v2651_v50  ;;  %708 = vmatpush.msrb.mxu1 %v682_v13  ;;  %v2680_v50 = vld [vmem:[%s3753_s14 + $0x30] sm:$0xff] }
 0x1bd   :  { %536 = vmatpush.bf16.msrb.mxu2 %v2643_v40  ;;  %v2671_v40 = vld [vmem:[%s3750_s12 + $0x48] sm:$0xff] }
 0x1bf   :  { %620 = vmatpush.bf16.msra.mxu3 %v2650_v51 }
 0x20c   :  { %v348_v1 = vpop.xlane.xlu2 %347 }
 0x20d   :  { %2777 = vrcp.f32 %v348_v1 }
 0x213   :  { %v2778_v3 = vpop.eup %2777 }
 0x214   :  { %v350_v4 = vmul.f32 %v2778_v3, %v2772_v41  ;;  %v2642_v41 = vld [vmem:[%s3748_s10] sm:$0xff] }
 0x215   :  { %537 = vmatpush.bf16.msrb.mxu2 %v2642_v41  ;;  %v2670_v41 = vld [vmem:[%s3750_s12 + $0x40] sm:$0xff] }
 0x216   :  { %352 = vrot.lane.b32.xlu2 %v350_v4, %s2795_s26 }
 0x221   :  { %v265_v17 = vpop.f32.mrf.mxu1 }
 0x222   :  { %v328_v32 = vmul.f32 %v265_v17, %v211_v29  ;;  %v2668_v17 = vld [vmem:[%s3748_s10 + $0x70] sm:$0xff] }
 0x227   :  { %v285_v26 = vpop.f32.mrf.mxu2 }
 0x228   :  { %v329_v14 = vmul.f32 %v285_v26, %v212_v23 }
 0x229   :  { %v305_v28 = vpop.f32.mrf.mxu1 }
 0x22a   :  { %v332_v33 = vadd.f32 %v329_v14, %v328_v32  ;;  %v330_v34 = vmul.f32 %v305_v28, %v213_v30  ;;  %v2663_v28 = vld [vmem:[%s3748_s10 + $0x48] sm:$0xff]  ;;  %v2676_v14 = vld [vmem:[%s3750_s12 + $0x70] sm:$0xff]  ;;  %v2674_v32 = vld [vmem:[%s3750_s12 + $0x60] sm:$0xff] }
 0x22c   :  { %v333_v36 = vadd.f32 %v332_v33, %v330_v34  ;;  %v2759_v33 = vld [vmem:[%s3755_s15] ss:$0 sm:$0xff] }
 0x231   :  { %v325_v35 = vpop.f32.mrf.mxu1 }
 0x232   :  { %v331_v37 = vmul.f32 %v325_v35, %v214_v16 }
 0x234   :  { %v334_v38 = vadd.f32 %v333_v36, %v331_v37 }
 0x236   :  { %458 = vst [vmem:[%s3749_s18] sm:$0xff] %v334_v38  ;;  %v461_v46 = vpack.c.bf16 %v334_v38, %v334_v38  ;;  %v2673_v38 = vld [vmem:[%s3750_s12 + $0x58] sm:$0xff] }
 0x270   :  { %v353_v45 = vpop.permute.xlu2 %352 }
 0x271   :  { %2054 = vmatmul.msk.f32.vlgmr.msra.gmra.mxu2 %vm215_vm2, %v353_v45  ;;  %2056 = vmatmul.msk.f32.vlgmr.msrb.gmra.mxu3 %vm215_vm2, %v353_v45 }
 0x272   :  { %2058 = vmatmul.msk.f32.vlgmr.msra.gmra.mxu0 %vm215_vm2, %v353_v45  ;;  %2060 = vmatmul.msk.f32.vlgmr.msra.gmra.mxu1 %vm215_vm2, %v353_v45  ;;  %v1026_v45 = vld [vmem:[%s3760_s6 + $0x28] sm:$0xff] }
 0x273   :  { %802 = vmatpush.bf16.msra.mxu1 %v2669_v15 }
 0x277   :  { %803 = vmatpush.bf16.msra.mxu1 %v2668_v17 }
 0x279   :  { %538 = vmatmul.bf16.vlgmr.msrb.gmra.mxu2 %v461_v46  ;;  %v2681_v46 = vld [vmem:[%s3753_s14 + $0x38] sm:$0xff] }
 0x27a   :  { %947 = vmatpush.bf16.msra.mxu2 %v2681_v46 }
 0x27b   :  { %804 = vmatpush.bf16.msra.mxu1 %v2667_v18  ;;  %v2270_v18 = vld [vmem:[%s3756_s16 + $0x30] sm:$0xff] }
 0x27e   :  { %948 = vmatpush.bf16.msra.mxu2 %v2680_v50 }
 0x27f   :  { %805 = vmatpush.bf16.msra.mxu1 %v2666_v19  ;;  %v2269_v19 = vld [vmem:[%s3756_s16 + $0x28] sm:$0xff] }
 0x283   :  { %806 = vmatpush.bf16.msra.mxu1 %v2665_v20  ;;  %v2268_v20 = vld [vmem:[%s3756_s16 + $0x20] sm:$0xff] }
 0x287   :  { %807 = vmatpush.bf16.msra.mxu1 %v2664_v27  ;;  %v2717_v27 = vld [vmem:[%s3762_s3 + $0x11c] sm:$0xf] }
 0x28b   :  { %808 = vmatpush.bf16.msra.mxu1 %v2663_v28 }
 0x2ef   :  { %v428_v54 = vpop.f32.mrf.mxu0  ;;  %v448_v59 = vpop.f32.mrf.mxu1 }
 0x2f0   :  { %v453_v60 = vmul.f32 %v428_v54, %v213_v30  ;;  %v454_v62 = vmul.f32 %v448_v59, %v214_v16  ;;  %v2677_v30 = vld [vmem:[%s3750_s12 + $0x78] sm:$0xff]  ;;  %v2761_v54 = vld [vmem:[%s3751_s11 + $0x1] ss:$0 sm:$0xff] }
 0x2f1   :  { %887 = vmatpush.bf16.msra.mxu0 %v2677_v30  ;;  %v2406_v30 = vld [vmem:[%s3762_s3 + $0xf0] sm:$0xf] }
 0x2f4   :  { %v388_v55 = vpop.f32.mrf.mxu2  ;;  %v408_v56 = vpop.f32.mrf.mxu3 }
 0x2f5   :  { %v451_v57 = vmul.f32 %v388_v55, %v211_v29  ;;  %v452_v58 = vmul.f32 %v408_v56, %v212_v23  ;;  %v2662_v29 = vld [vmem:[%s3748_s10 + $0x40] sm:$0xff]  ;;  %888 = vmatpush.bf16.msra.mxu0 %v2676_v14 }
 0x2f6   :  { %809 = vmatpush.bf16.msra.mxu1 %v2662_v29  ;;  %v2428_v29 = vld [vmem:[%s3762_s3 + $0x12c] sm:$0xf0]  ;;  %v2714_v14 = vld [vmem:[%s3762_s3 + $0x100] sm:$0xf0] }
 0x2f7   :  { %v455_v61 = vadd.f32 %v452_v58, %v451_v57 }
 0x2f9   :  { %v456_v63 = vadd.f32 %v455_v61, %v453_v60  ;;  %889 = vmatpush.bf16.msra.mxu0 %v2675_v31  ;;  %v2431_v31 = vor.u32 %v2717_v27, %v2428_v29  ;;  %v2422_v27 = vld [vmem:[%s3762_s3 + $0x100] sm:$0xf]  ;;  %v2716_v29 = vld [vmem:[%s3762_s3 + $0x110] sm:$0xf0] }
 0x2fb   :  { %v3096_v1 = vadd.f32 %v456_v63, %v454_v62  ;;  %v2679_v63 = vld [vmem:[%s3753_s14 + $0x28] sm:$0xff] }
 0x2fc   :  { %v539_v2 = vpop.f32.mrf.mxu2  ;;  %949 = vmatpush.bf16.msra.mxu2 %v2679_v63 }
 0x2fd   :  { %2061 = vst [vmem:[%s3749_s18 + $0x8] sm:$0xff] %v3096_v1  ;;  %v540_v3 = vadd.f32 %v2757_v0, %v539_v2  ;;  %890 = vmatpush.bf16.msra.mxu0 %v2674_v32  ;;  %v731_v37 = vpack.c.bf16 %v3096_v1, %v3096_v1  ;;  %v1072_v0 = vld [vmem:[%s3761_s7] sm:$0x1f]  ;;  %v2271_v2 = vld [vmem:[%s3756_s16 + $0x38] sm:$0xff]  ;;  %v2712_v32 = vld [vmem:[%s3762_s3 + $0xf4] sm:$0xf] }
 0x2fe   :  { %v2678_v1 = vld [vmem:[%s3753_s14 + $0x20] sm:$0xff]  ;;  %982 = vmatpush.msrb.mxu3 %v2271_v2  ;;  %v2689_v2 = vld [vmem:[%s3762_s3 + $0x38] sm:$0xf0] }
 0x2ff   :  { %v543_v4 = vmax.f32 %v540_v3, 0.0  ;;  %v2762_v3 = vld [vmem:[%s3758_s8] ss:$0 sm:$0xff] }
 0x300   :  { %950 = vmatpush.bf16.msra.mxu2 %v2678_v1  ;;  %983 = vmatpush.msrb.mxu3 %v2270_v18  ;;  %v2306_v1 = vld [vmem:[%s3762_s3 + $0x28] sm:$0xf] }
 0x301   :  { %v544_v5 = vpack.c.bf16 %v543_v4, %v543_v4  ;;  %718 = vst [vmem:[%s3754_s19] sm:$0xff] %v543_v4  ;;  %891 = vmatpush.bf16.msra.mxu0 %v2673_v38  ;;  %v2763_v4 = vld [vmem:[%s3759_s9] ss:$0 sm:$0xff] }
 0x302   :  { %984 = vmatpush.msrb.mxu3 %v2269_v19  ;;  %v2388_v38 = vld [vmem:[%s3762_s3 + $0xdc] sm:$0xf0] }
 0x303   :  { %621 = vmatmul.bf16.vlgmr.msra.gmra.mxu3 %v544_v5 }
 0x304   :  { %v541_v6 = vpop.f32.mrf.mxu2  ;;  %985 = vmatpush.msrb.mxu3 %v2268_v20  ;;  %1490 = vmatpush.bf16.msrb.mxu2 %v2431_v31  ;;  %v2724_v31 = vld [vmem:[%s3762_s3 + $0x150] sm:$0xf0] }
 0x305   :  { %892 = vmatpush.bf16.msra.mxu0 %v2672_v39  ;;  %v2764_v6 = vld [vmem:[%s3752_s13 + $0x1] ss:$0 sm:$0xff] }
 0x309   :  { %893 = vmatpush.bf16.msra.mxu0 %v2671_v40  ;;  %v2765_v40 = vld [vmem:[%s3755_s15 + $0x1] ss:$0 sm:$0xff] }
 0x30d   :  { %894 = vmatpush.bf16.msra.mxu0 %v2670_v41 }
 0x386   :  { %v622_v22 = vpop.f32.mrf.mxu3 }
 0x387   :  { %v623_v23 = vadd.f32 %v2758_v21, %v622_v22  ;;  %v1027_v21 = vld [vmem:[%s3760_s6 + $0x30] sm:$0xff]  ;;  %v1025_v22 = vld [vmem:[%s3760_s6 + $0x20] sm:$0xff] }
 0x388   :  { %1044 = vmatpush.msra.mxu3 %v1027_v21 }
 0x389   :  { %v626_v24 = vmax.f32 %v623_v23, 0.0  ;;  %v1023_v23 = vld [vmem:[%s3760_s6 + $0x10] sm:$0xff] }
 0x38a   :  { %1045 = vmatpush.msra.mxu3 %v1025_v22  ;;  %v2466_v22 = vld [vmem:[%s3762_s3 + $0x168] sm:$0xf] }
 0x38b   :  { %v627_v25 = vpack.c.bf16 %v626_v24, %v626_v24  ;;  %719 = vst.msk [vmem:[%s3754_s19 + $0x8] sm:$0xff] %vm664_vm4, %v626_v24  ;;  %v1021_v24 = vld [vmem:[%s3760_s6] sm:$0xff] }
 0x38c   :  { %1046 = vmatpush.msra.mxu3 %v1023_v23  ;;  %v2729_v23 = vld [vmem:[%s3762_s3 + $0x178] sm:$0xf0] }
 0x38d   :  { %2142 = vmatmul.msk.bf16.vlgmr.msrb.gmra.mxu0 %vm664_vm4, %v627_v25  ;;  %v2426_v25 = vld [vmem:[%s3762_s3 + $0x118] sm:$0xf] }
 0x38e   :  { %v624_v26 = vpop.f32.mrf.mxu3  ;;  %1047 = vmatpush.msra.mxu3 %v1021_v24  ;;  %v2467_v24 = vor.u32 %v2729_v23, %v2466_v22  ;;  %v2334_v23 = vld [vmem:[%s3762_s3 + $0x58] sm:$0xf] }
 0x38f   :  { %v2719_v26 = vld [vmem:[%s3762_s3 + $0x128] sm:$0xf0] }
 0x390   :  { %v2427_v28 = vor.u32 %v2719_v26, %v2426_v25  ;;  %v2713_v25 = vld [vmem:[%s3762_s3 + $0xfc] sm:$0xf]  ;;  %v2416_v26 = vld [vmem:[%s3762_s3 + $0x10c] sm:$0xf0] }
 0x392   :  { %1464 = vmatpush.bf16.msrb.mxu0 %v2427_v28  ;;  %v2419_v28 = vor.u32 %v2713_v25, %v2416_v26  ;;  %v2683_v25 = vld [vmem:[%s3762_s3 + $0xc] sm:$0xf]  ;;  %v2296_v26 = vld [vmem:[%s3762_s3 + $0x1c] sm:$0xf0] }
 0x40a   :  { %v677_v34 = vpop.f32.mrf.mxu0 }
 0x40b   :  { %v678_v16 = vadd.f32 %v2759_v33, %v677_v34  ;;  %v2408_v33 = vld [vmem:[%s3762_s3 + $0x104] sm:$0xf0]  ;;  %v2407_v34 = vor.u32 %v2714_v14, %v2406_v30  ;;  %v2423_v30 = vor.u32 %v2716_v29, %v2422_v27  ;;  %v2446_v14 = vld [vmem:[%s3762_s3 + $0x140] sm:$0xf]  ;;  %v2302_v27 = vld [vmem:[%s3762_s3 + $0x10] sm:$0xf] }
 0x40d   :  { %v681_v35 = vmax.f32 %v678_v16, 0.0  ;;  %v2411_v16 = vor.u32 %v2712_v32, %v2408_v33  ;;  %1465 = vmatpush.bf16.msrb.mxu0 %v2407_v34  ;;  %v2447_v32 = vor.u32 %v2724_v31, %v2446_v14  ;;  %v2434_v33 = vld [vmem:[%s3762_s3 + $0x120] sm:$0xf]  ;;  %v2720_v34 = vld [vmem:[%s3762_s3 + $0x130] sm:$0xf0] }
 0x40e   :  { %v2314_v31 = vld [vmem:[%s3762_s3 + $0x30] sm:$0xf] }
 0x40f   :  { %2143 = vmatmul.msk.f32.vlgmr.msrb.gmra.mxu1 %vm142_vm0, %v681_v35  ;;  %1491 = vmatpush.bf16.msrb.mxu2 %v2411_v16  ;;  %v2708_v16 = vld [vmem:[%s3762_s3 + $0xd4] sm:$0xf] }
 0x410   :  { %1064 = vmatpush.msrb.mxu1 %v1028_v44  ;;  %v2702_v44 = vld [vmem:[%s3762_s3 + $0xa4] sm:$0xf] }
 0x412   :  { %v679_v36 = vpop.f32.mrf.mxu0  ;;  %1065 = vmatpush.msrb.mxu1 %v1026_v45  ;;  %v2368_v45 = vld [vmem:[%s3762_s3 + $0xb4] sm:$0xf0] }
 0x413   :  { %v2709_v36 = vld [vmem:[%s3762_s3 + $0xd8] sm:$0xf0] }
 0x414   :  { %1066 = vmatpush.msrb.mxu1 %v1024_v49  ;;  %v2371_v49 = vor.u32 %v2702_v44, %v2368_v45  ;;  %v2376_v45 = vld [vmem:[%s3762_s3 + $0xbc] sm:$0xf0] }
 0x416   :  { %1067 = vmatpush.msrb.mxu1 %v1022_v52 }
 0x417   :  { %810 = vmatmul.bf16.vlgmr.msra.gmra.mxu1 %v731_v37  ;;  %v2707_v37 = vld [vmem:[%s3762_s3 + $0xcc] sm:$0xf] }
 0x418   :  { %2280 = vmatpush.msk.msra.mxu1 %vm1078_vm5, %v1072_v0  ;;  %v2391_v41 = vor.u32 %v2707_v37, %v2388_v38  ;;  %v2402_v37 = vld [vmem:[%s3762_s3 + $0xd8] sm:$0xf]  ;;  %v2711_v38 = vld [vmem:[%s3762_s3 + $0xe8] sm:$0xf0] }
 0x41a   :  { %1492 = vmatpush.bf16.msrb.mxu2 %v2391_v41  ;;  %v2414_v41 = vld [vmem:[%s3762_s3 + $0xf8] sm:$0xf] }
 0x41e   :  { %1493 = vmatpush.bf16.msrb.mxu2 %v2371_v49 }
 0x427   :  { %2279 = vmatmul.msk.f32.vlgmr.msrb.gmra.mxu1 %vm142_vm0, %v2920_v8 }
 0x428   :  { %1483 = vmatpush.bf16.msrb.mxu1 %v2467_v24  ;;  %v2695_v24 = vld [vmem:[%s3762_s3 + $0x68] sm:$0xf0] }
 0x429   :  { %v2335_v29 = vor.u32 %v2695_v24, %v2334_v23 }
 0x42c   :  { %1484 = vmatpush.bf16.msrb.mxu1 %v2447_v32  ;;  %v2690_v32 = vld [vmem:[%s3762_s3 + $0x40] sm:$0xf0] }
 0x48c   :  { %v710_v47 = vpop.f32.mrf.mxu1 }
 0x48d   :  { %v711_v48 = vadd.f32 %v2760_v43, %v710_v47  ;;  %v2704_v43 = vld [vmem:[%s3762_s3 + $0xb0] sm:$0xf0] }
 0x48e   :  { %v2367_v47 = vor.u32 %v2704_v43, %v2366_v42  ;;  %v2715_v42 = vld [vmem:[%s3762_s3 + $0x108] sm:$0xf0] }
 0x48f   :  { %v713_v51 = vsub.f32 0.0, %v711_v48  ;;  %v2703_v43 = vld [vmem:[%s3762_s3 + $0xac] sm:$0xf]  ;;  %v2415_v44 = vor.u32 %v2715_v42, %v2414_v41 }
 0x491   :  { %v714_v53 = vmul.f32 1.442695, %v713_v51  ;;  %v1073_v51 = vld [vmem:[%s3761_s7 + $0x8] sm:$0x1f] }
 0x493   :  { %2779 = vpow2.f32 %v714_v53  ;;  %v2346_v53 = vld [vmem:[%s3762_s3 + $0x78] sm:$0xf] }
 0x494   :  { %v811_v55 = vpop.f32.mrf.mxu1 }
 0x495   :  { %v812_v56 = vadd.f32 %v2761_v54, %v811_v55  ;;  %v2699_v54 = vld [vmem:[%s3762_s3 + $0x88] sm:$0xf0]  ;;  %v2697_v55 = vld [vmem:[%s3762_s3 + $0x7c] sm:$0xf] }
 0x497   :  { %v815_v57 = vmax.f32 %v812_v56, 0.0  ;;  %v2347_v56 = vor.u32 %v2699_v54, %v2346_v53  ;;  %v2710_v54 = vld [vmem:[%s3762_s3 + $0xe0] sm:$0xf0] }
 0x499   :  { %v2780_v58 = vpop.eup %2779  ;;  %v816_v59 = vpack.c.bf16 %v815_v57, %v815_v57  ;;  %2274 = vst [vmem:[%s3754_s19 + $0x10] sm:$0xff] %v815_v57  ;;  %v2326_v57 = vld [vmem:[%s3762_s3 + $0x50] sm:$0xf] }
 0x49a   :  { %v716_v60 = vadd.f32 1.0, %v2780_v58  ;;  %v2694_v58 = vld [vmem:[%s3762_s3 + $0x60] sm:$0xf0] }
 0x49b   :  { %895 = vmatmul.bf16.vlgmr.msra.gmra.mxu0 %v816_v59  ;;  %v2327_v63 = vor.u32 %v2694_v58, %v2326_v57  ;;  %v2362_v58 = vld [vmem:[%s3762_s3 + $0x88] sm:$0xf] }
 0x49c   :  { %2781 = vrcp.f32 %v716_v60  ;;  %v813_v61 = vpop.f32.mrf.mxu1  ;;  %v2692_v60 = vld [vmem:[%s3762_s3 + $0x54] sm:$0xf] }
 0x49d   :  { %v2328_v61 = vld [vmem:[%s3762_s3 + $0x64] sm:$0xf0] }
 0x49e   :  { %v2331_v0 = vor.u32 %v2692_v60, %v2328_v61 }
 0x4a2   :  { %v3214_v62 = vpop.eup %2781 }
 0x4a3   :  { %1009 = vperm.xlu0 %2756, %v3214_v62  }
 0x4ab   :  { %720 = vrot.lane.b32.xlu0 %v681_v35, %s2797_s21  ;;  %v2386_v35 = vld [vmem:[%s3762_s3 + $0xc8] sm:$0xf] }
 0x4ac   :  { %v2387_v39 = vor.u32 %v2709_v36, %v2386_v35  ;;  %v2435_v35 = vor.u32 %v2720_v34, %v2434_v33  ;;  %v2396_v36 = vld [vmem:[%s3762_s3 + $0xe4] sm:$0xf0]  ;;  %v2474_v33 = vld [vmem:[%s3762_s3 + $0x170] sm:$0xf]  ;;  %v2315_v34 = vor.u32 %v2690_v32, %v2314_v31 }
 0x4ae   :  { %1466 = vmatpush.bf16.msrb.mxu0 %v2387_v39  ;;  %v2399_v39 = vor.u32 %v2708_v16, %v2396_v36  ;;  %v2730_v16 = vld [vmem:[%s3762_s3 + $0x180] sm:$0xf0]  ;;  %v2685_v36 = vld [vmem:[%s3762_s3 + $0x18] sm:$0xf0] }
 0x4b2   :  { %1467 = vmatpush.bf16.msrb.mxu0 %v2367_v47  ;;  %v2706_v47 = vld [vmem:[%s3762_s3 + $0xc0] sm:$0xf0] }
 0x4b6   :  { %1468 = vmatpush.bf16.msrb.mxu0 %v2347_v56  ;;  %v2356_v56 = vld [vmem:[%s3762_s3 + $0x94] sm:$0xf0] }
 0x4ba   :  { %1469 = vmatpush.bf16.msrb.mxu0 %v2327_v63  ;;  %v2722_v63 = vld [vmem:[%s3762_s3 + $0x144] sm:$0xf] }
 0x515   :  { %v1010_v5 = vpop.permute.xlu0 %1009 }
 0x516   :  { %v1015_v7 = vmul.f32 %v2762_v3, %v1010_v5  ;;  %v2687_v3 = vld [vmem:[%s3762_s3 + $0x2c] sm:$0xf]  ;;  %v2307_v5 = vor.u32 %v2689_v2, %v2306_v1  ;;  %v2374_v2 = vld [vmem:[%s3762_s3 + $0xa8] sm:$0xf] }
 0x518   :  { %v3240_v9 = vadd.f32 %v2763_v4, %v1015_v7  ;;  %v896_v10 = vpop.f32.mrf.mxu0  ;;  %v2308_v4 = vld [vmem:[%s3762_s3 + $0x3c] sm:$0xf0]  ;;  %1470 = vmatpush.bf16.msrb.mxu0 %v2307_v5 }
 0x519   :  { %v897_v11 = vadd.f32 %v2764_v6, %v896_v10  ;;  %v2311_v6 = vor.u32 %v2687_v3, %v2308_v4  ;;  %v2286_v7 = vld [vmem:[%s3762_s3] sm:$0xf]  ;;  %v2682_v10 = vld [vmem:[%s3762_s3 + $0x4] sm:$0xf]  ;;  %v2705_v3 = vld [vmem:[%s3762_s3 + $0xb8] sm:$0xf0] }
 0x51a   :  { %2281 = vmatmul.msk.f32.vlgmr.msra.gmra.mxu1 %vm1074_vm6, %v3240_v9  ;;  %v2693_v4 = vld [vmem:[%s3762_s3 + $0x5c] sm:$0xf]  ;;  %v2375_v5 = vor.u32 %v2705_v3, %v2374_v2 }
 0x51b   :  { %v900_v12 = vmax.f32 %v897_v11, 0.0  ;;  %v2288_v11 = vld [vmem:[%s3762_s3 + $0x14] sm:$0xf0]  ;;  %1516 = vmatpush.bf16.msra.mxu1 %v2435_v35  ;;  %v2294_v35 = vld [vmem:[%s3762_s3 + $0x8] sm:$0xf] }
 0x51c   :  { %v2291_v19 = vor.u32 %v2682_v10, %v2288_v11  ;;  %v2295_v42 = vor.u32 %v2685_v36, %v2294_v35 }
 0x51d   :  { %v901_v13 = vpack.c.bf16 %v900_v12, %v900_v12  ;;  %2275 = vst.msk [vmem:[%s3754_s19 + $0x18] sm:$0xff] %vm664_vm4, %v900_v12  ;;  %v721_v15 = vpop.permute.xlu0 %720  ;;  %v2718_v12 = vld [vmem:[%s3762_s3 + $0x124] sm:$0xf] }
 0x51e   :  { %724 = vst.msk [vmem:[%s3754_s19 + $0x8] sm:$0xff] %vm723_vm7, %v721_v15  ;;  %v2442_v15 = vld [vmem:[%s3762_s3 + $0x128] sm:$0xf] }
 0x51f   :  { %2267 = vmatmul.msk.bf16.vlgmr.msra.gmra.mxu2 %vm664_vm4, %v901_v13  ;;  %v2436_v13 = vld [vmem:[%s3762_s3 + $0x134] sm:$0xf0]  ;;  %1517 = vmatpush.bf16.msra.mxu1 %v2415_v44 }
 0x520   :  { %v898_v17 = vpop.f32.mrf.mxu0  ;;  %v2439_v20 = vor.u32 %v2718_v12, %v2436_v13  ;;  %v2354_v12 = vld [vmem:[%s3762_s3 + $0x80] sm:$0xf]  ;;  %v2700_v13 = vld [vmem:[%s3762_s3 + $0x90] sm:$0xf0] }
 0x521   :  { %v2721_v17 = vld [vmem:[%s3762_s3 + $0x138] sm:$0xf0] }
 0x522   :  { %v2443_v21 = vor.u32 %v2721_v17, %v2442_v15  ;;  %v2688_v15 = vld [vmem:[%s3762_s3 + $0x34] sm:$0xf]  ;;  %v2355_v17 = vor.u32 %v2700_v13, %v2354_v12 }
 0x5a2   :  { %v952_v46 = vpop.f32.mrf.mxu2 }
 0x5a3   :  { %v953_v48 = vadd.f32 %v2765_v40, %v952_v46  ;;  %v2403_v40 = vor.u32 %v2711_v38, %v2402_v37  ;;  %v2382_v46 = vld [vmem:[%s3762_s3 + $0xb0] sm:$0xf]  ;;  %v1069_v37 = vpop.f32.mrf.mxu1  ;;  %v2475_v38 = vor.u32 %v2730_v16, %v2474_v33 }
 0x5a4   :  { %v2383_v49 = vor.u32 %v2706_v47, %v2382_v46 }
 0x5a5   :  { %v956_v50 = vmax.f32 %v953_v48, 0.0  ;;  %v2379_v48 = vor.u32 %v2703_v43, %v2376_v45 }
 0x5a7   :  { %2273 = vmatmul.msk.f32.vlgmr.msrb.gmra.mxu3 %vm142_vm0, %v956_v50  ;;  %998 = vrot.lane.b32.xlu0 %v956_v50, %s2797_s21  ;;  %v2727_v50 = vld [vmem:[%s3762_s3 + $0x16c] sm:$0xf] }
 0x5a8   :  { %2282 = vmatpush.msk.msrb.mxu3 %vm1078_vm5, %v1073_v51  ;;  %v2468_v51 = vld [vmem:[%s3762_s3 + $0x17c] sm:$0xf0] }
 0x5a9   :  { %v2471_v53 = vor.u32 %v2727_v50, %v2468_v51  ;;  %v2728_v50 = vld [vmem:[%s3762_s3 + $0x174] sm:$0xf]  ;;  %v2476_v51 = vld [vmem:[%s3762_s3 + $0x184] sm:$0xf0] }
 0x5aa   :  { %v954_v52 = vpop.f32.mrf.mxu2 }
 0x5ab   :  { %v2394_v52 = vld [vmem:[%s3762_s3 + $0xd0] sm:$0xf]  ;;  %v1102_v44 = vpop.f32.mrf.mxu1 }
 0x5af   :  { %2278 = vmatmul.msk.f32.vlgmr.msra.gmra.mxu3 %vm142_vm0, %v2920_v8  ;;  %v2348_v8 = vld [vmem:[%s3762_s3 + $0x8c] sm:$0xf0] }
 0x5b0   :  { %v2351_v59 = vor.u32 %v2697_v55, %v2348_v8  ;;  %v2698_v55 = vld [vmem:[%s3762_s3 + $0x84] sm:$0xf]  ;;  %v2395_v8 = vor.u32 %v2710_v54, %v2394_v52  ;;  %1509 = vmatpush.bf16.msra.mxu3 %v2471_v53 }
 0x5b1   :  { %v2359_v57 = vor.u32 %v2698_v55, %v2356_v56  ;;  %v2462_v55 = vld [vmem:[%s3762_s3 + $0x150] sm:$0xf]  ;;  %v2479_v56 = vor.u32 %v2728_v50, %v2476_v51  ;;  %v1615_v51 = vld.sshfl [vmem:[#allocation1 + $0x18] sm:$0xff pattern:$0x75316420] }
 0x5b2   :  { %1494 = vmatpush.bf16.msrb.mxu2 %v2351_v59  ;;  %v2701_v59 = vld [vmem:[%s3762_s3 + $0x98] sm:$0xf0]  ;;  %1518 = vmatpush.bf16.msra.mxu1 %v2395_v8  ;;  %v1614_v50 = vld.sshfl [vmem:[#allocation1 + $0x10] sm:$0xff pattern:$0x75316420] }
 0x5b3   :  { %v2363_v61 = vor.u32 %v2701_v59, %v2362_v58  ;;  %v2723_v58 = vld [vmem:[%s3762_s3 + $0x14c] sm:$0xf]  ;;  %v2456_v59 = vld [vmem:[%s3762_s3 + $0x15c] sm:$0xf0] }
 0x5b6   :  { %1495 = vmatpush.bf16.msrb.mxu2 %v2331_v0  ;;  %v2448_v0 = vld [vmem:[%s3762_s3 + $0x154] sm:$0xf0]  ;;  %1519 = vmatpush.bf16.msra.mxu1 %v2375_v5 }
 0x5b7   :  { %2283 = vmatmul.msk.f32.vlgmr.msrb.gmra.mxu3 %vm1074_vm6, %v3240_v9  ;;  %v2684_v9 = vld [vmem:[%s3762_s3 + $0x10] sm:$0xf0]  ;;  %v2451_v1 = vor.u32 %v2722_v63, %v2448_v0  ;;  %v1189_v63 = vld [vmem:[%s3763_s4] sm:$0x1f]  ;;  %s2798_s4 = smov 96  }
 0x5b8   :  { %v2287_v18 = vor.u32 %v2684_v9, %v2286_v7  ;;  %v2342_v7 = vld [vmem:[%s3762_s3 + $0x60] sm:$0xf]  ;;  %v2696_v9 = vld [vmem:[%s3762_s3 + $0x70] sm:$0xf0] }
 0x5b9   :  { %1510 = vmatpush.bf16.msra.mxu3 %v2451_v1  ;;  %v2343_v11 = vor.u32 %v2696_v9, %v2342_v7  ;;  %v1191_v1 = vperm.slane %v1189_v63, 0 }
 0x5ba   :  { %1496 = vmatpush.bf16.msrb.mxu2 %v2311_v6  ;;  %1471 = vmatpush.bf16.msrb.mxu0 %v2287_v18  ;;  %v2336_v6 = vld [vmem:[%s3762_s3 + $0x6c] sm:$0xf0]  ;;  %v2316_v18 = vld [vmem:[%s3762_s3 + $0x44] sm:$0xf0] }
 0x5bb   :  { %v2339_v10 = vor.u32 %v2693_v4, %v2336_v6  ;;  %1520 = vmatpush.bf16.msra.mxu1 %v2355_v17  ;;  %v1192_v6 = vperm.slane %v1189_v63, 1 }
 0x5bd   :  { %1535 = vmatpush.bf16.msrb.mxu3 %v2475_v38 }
 0x5be   :  { %1497 = vmatpush.bf16.msrb.mxu2 %v2291_v19  ;;  %1542 = vmatpush.bf16.msra.mxu0 %v2439_v20  ;;  %v2322_v19 = vld [vmem:[%s3762_s3 + $0x38] sm:$0xf]  ;;  %v2691_v20 = vld [vmem:[%s3762_s3 + $0x48] sm:$0xf0] }
 0x5bf   :  { %v2323_v22 = vor.u32 %v2691_v20, %v2322_v19  ;;  %1521 = vmatpush.bf16.msra.mxu1 %v2335_v29 }
 0x5c2   :  { %1568 = vmatpush.bf16.msra.mxu2 %v2443_v21  ;;  %1543 = vmatpush.bf16.msra.mxu0 %v2419_v28  ;;  %v2319_v21 = vor.u32 %v2688_v15, %v2316_v18  ;;  %v2686_v28 = vld [vmem:[%s3762_s3 + $0x20] sm:$0xf0] }
 0x5c3   :  { %v2303_v14 = vor.u32 %v2686_v28, %v2302_v27  ;;  %1522 = vmatpush.bf16.msra.mxu1 %v2315_v34  ;;  %v1195_v27 = vperm.slane %v1189_v63, 4 }
 0x5c6   :  { %1569 = vmatpush.bf16.msra.mxu2 %v2423_v30  ;;  %1544 = vmatpush.bf16.msra.mxu0 %v2399_v39  ;;  %v2299_v30 = vor.u32 %v2683_v25, %v2296_v26  ;;  %v2454_v39 = vld [vmem:[%s3762_s3 + $0x148] sm:$0xf] }
 0x5c7   :  { %1523 = vmatpush.bf16.msra.mxu1 %v2295_v42 }
 0x5ca   :  { %1570 = vmatpush.bf16.msra.mxu2 %v2403_v40  ;;  %1545 = vmatpush.bf16.msra.mxu0 %v2379_v48  ;;  %v2725_v40 = vld [vmem:[%s3762_s3 + $0x158] sm:$0xf0]  ;;  %v2482_v48 = vld [vmem:[%s3762_s3 + $0x178] sm:$0xf] }
 0x5cb   :  { %v2455_v43 = vor.u32 %v2725_v40, %v2454_v39  ;;  %v2766_v39 = vld [vmem:[%s3757_s17 + $0x1] ss:$0 sm:$0xff] }
 0x5cd   :  { %1536 = vmatpush.bf16.msrb.mxu3 %v2455_v43  ;;  %v1612_v43 = vld.sshfl [vmem:[#allocation1] sm:$0xff pattern:$0x75316420] }
 0x5ce   :  { %1571 = vmatpush.bf16.msra.mxu2 %v2383_v49  ;;  %1546 = vmatpush.bf16.msra.mxu0 %v2359_v57  ;;  %v2731_v49 = vld [vmem:[%s3762_s3 + $0x188] sm:$0xf0]  ;;  %v2726_v57 = vld [vmem:[%s3762_s3 + $0x160] sm:$0xf0] }
 0x5cf   :  { %v2483_v54 = vor.u32 %v2731_v49, %v2482_v48 }
 0x5d2   :  { %1572 = vmatpush.bf16.msra.mxu2 %v2363_v61  ;;  %1547 = vmatpush.bf16.msra.mxu0 %v2339_v10  ;;  %v2459_v61 = vor.u32 %v2723_v58, %v2456_v59  ;;  %v2737_v58 = vld [vmem:[%s3748_s10 + $0xa8] sm:$0xff]  ;;  %v2736_v59 = vld [vmem:[%s3748_s10 + $0xa0] sm:$0xff] }
 0x5d6   :  { %1573 = vmatpush.bf16.msra.mxu2 %v2343_v11  ;;  %1548 = vmatpush.bf16.msra.mxu0 %v2319_v21  ;;  %v1193_v21 = vperm.slane %v1189_v63, 2 }
 0x5da   :  { %1574 = vmatpush.bf16.msra.mxu2 %v2323_v22  ;;  %1549 = vmatpush.bf16.msra.mxu0 %v2299_v30 }
 0x5de   :  { %1575 = vmatpush.bf16.msra.mxu2 %v2303_v14  ;;  %v1194_v14 = vperm.slane %v1189_v63, 3  ;;  %v2733_v63 = vld [vmem:[%s3748_s10 + $0x88] sm:$0xff] }
 0x619   :  { %v999_v60 = vpop.permute.xlu0 %998 }
 0x61a   :  { %2276 = vst.msk [vmem:[%s3754_s19 + $0x18] sm:$0xff] %vm723_vm7, %v999_v60  ;;  %v2463_v60 = vor.u32 %v2726_v57, %v2462_v55 }
 0x62a   :  { %v3567_v41 = vpop.f32.mrf.mxu3 }
 0x62b   :  { %v988_v42 = vadd.f32 %v2766_v39, %v3567_v41 }
 0x632   :  { %v1049_v45 = vpop.f32.mrf.mxu3 }
 0x633   :  { %v1125_v46 = vmul.f32 %v1102_v44, %v1049_v45 }
 0x635   :  { %v1127_v47 = vpack.c.bf16 %v1125_v46, %v1125_v46 }
 0x637   :  { %1472 = vmatmul.bf16.vlgmr.msrb.gmra.mxu0 %v1127_v47  ;;  %1498 = vmatmul.bf16.vlgmr.msrb.gmra.mxu2 %v1127_v47 }
 0x638   :  { %2493 = vmatpush.msk.msrb.mxu0 %vm239_vm3, %v1614_v50 }
 0x63a   :  { %v1122_v52 = vpop.f32.mrf.mxu3 }
 0x63b   :  { %v1126_v53 = vmul.f32 %v1122_v52, %v1069_v37  ;;  %v1613_v52 = vld.sshfl [vmem:[#allocation1 + $0x8] sm:$0xff pattern:$0x75316420] }
 0x63d   :  { %v1128_v8 = vpack.c.bf16 %v1126_v53, %v1126_v53  ;;  %v2739_v53 = vld [vmem:[%s3748_s10 + $0xb8] sm:$0xff] }
 0x63e   :  { %1787 = vmatpush.bf16.msrb.mxu2 %v2739_v53 }
 0x63f   :  { %2484 = vmatmul.msk.bf16.vlgmr.msrb.gmra.mxu1 %vm142_vm0, %v1128_v8  ;;  %2485 = vmatmul.msk.bf16.vlgmr.msra.gmra.mxu3 %vm142_vm0, %v1128_v8 }
 0x640   :  { %1587 = vmatpush.bf16.msrb.mxu1 %v2483_v54  ;;  %1561 = vmatpush.bf16.msra.mxu3 %v2479_v56  ;;  %v2738_v54 = vld [vmem:[%s3748_s10 + $0xb0] sm:$0xff] }
 0x642   :  { %1788 = vmatpush.bf16.msrb.mxu2 %v2738_v54 }
 0x644   :  { %1588 = vmatpush.bf16.msrb.mxu1 %v2463_v60  ;;  %1562 = vmatpush.bf16.msra.mxu3 %v2459_v61  ;;  %v2735_v60 = vld [vmem:[%s3748_s10 + $0x98] sm:$0xff]  ;;  %v2734_v61 = vld [vmem:[%s3748_s10 + $0x90] sm:$0xff] }
 0x646   :  { %1789 = vmatpush.bf16.msrb.mxu2 %v2737_v58 }
 0x647   :  { %1550 = vmatmul.bf16.vlgmr.msra.gmra.mxu0 %v1127_v47  ;;  %1576 = vmatmul.bf16.vlgmr.msra.gmra.mxu2 %v1127_v47 }
 0x64a   :  { %1790 = vmatpush.bf16.msrb.mxu2 %v2736_v59 }
 0x64e   :  { %1791 = vmatpush.bf16.msrb.mxu2 %v2735_v60 }
 0x64f   :  { %1524 = vmatmul.bf16.vlgmr.msra.gmra.mxu1 %v1127_v47  ;;  %2486 = vmatmul.msk.bf16.vlgmr.msrb.gmra.mxu3 %vm142_vm0, %v1128_v8 }
 0x650   :  { %2489 = vmatpush.msk.msrb.mxu3 %vm239_vm3, %v1612_v43  ;;  %2495 = vmatpush.msk.msra.mxu1 %vm239_vm3, %v1615_v51  ;;  %v2770_v51 = vld [vmem:[%s3757_s17 + $0x2] ss:$0 sm:$0xff] }
 0x652   :  { %1792 = vmatpush.bf16.msrb.mxu2 %v2734_v61 }
 0x656   :  { %1793 = vmatpush.bf16.msrb.mxu2 %v2733_v63 }
 0x65f   :  { %2487 = vmatmul.msk.bf16.vlgmr.msra.gmra.mxu3 %vm142_vm0, %v1128_v8  ;;  %2488 = vmatmul.msk.bf16.vlgmr.msrb.gmra.mxu1 %vm142_vm0, %v1128_v8 }
 0x660   :  { %2491 = vmatpush.msk.msra.mxu3 %vm239_vm3, %v1613_v52 }
 0x6b4   :  { %v1473_v0 = vpop.f32.mrf.mxu0 }
 0x6b5   :  { %v1474_v3 = vadd.f32 %v1473_v0, %v1191_v1  ;;  %v2732_v0 = vld [vmem:[%s3748_s10 + $0x80] sm:$0xff]  ;;  %v2747_v1 = vld [vmem:[%s3750_s12 + $0xb8] sm:$0xff] }
 0x6b6   :  { %1794 = vmatpush.bf16.msrb.mxu2 %v2732_v0 }
 0x6ba   :  { %v1499_v2 = vpop.f32.mrf.mxu2 }
 0x6bb   :  { %v1500_v9 = vadd.f32 %v1499_v2, %v1192_v6  ;;  %v2746_v2 = vld [vmem:[%s3750_s12 + $0xb0] sm:$0xff]  ;;  %v2743_v6 = vld [vmem:[%s3750_s12 + $0x98] sm:$0xff] }
 0x6bc   :  { %v1475_v4 = vpop.f32.mrf.mxu0  ;;  %v1486_v5 = vpop.f32.mrf.mxu1 }
 0x6bd   :  { %v3601_v7 = vadd.f32 %v1486_v5, %v1474_v3  ;;  %v2745_v3 = vld [vmem:[%s3750_s12 + $0xa8] sm:$0xff]  ;;  %v2744_v4 = vld [vmem:[%s3750_s12 + $0xa0] sm:$0xff] }
 0x6c2   :  { %v1501_v10 = vpop.f32.mrf.mxu2  ;;  %v1512_v11 = vpop.f32.mrf.mxu3 }
 0x6c3   :  { %v3603_v12 = vadd.f32 %v1512_v11, %v1500_v9  ;;  %v2742_v9 = vld [vmem:[%s3750_s12 + $0x90] sm:$0xff]  ;;  %v1594_v10 = vmax.f32 %v3601_v7, 0.0 }
 0x6c4   :  { %v1488_v13 = vpop.f32.mrf.mxu1  ;;  %v1551_v15 = vpop.f32.mrf.mxu0 }
 0x6c5   :  { %v1552_v33 = vadd.f32 %v1551_v15, %v1194_v14  ;;  %v1595_v11 = vmax.f32 %v3603_v12, 0.0  ;;  %v2741_v12 = vld [vmem:[%s3750_s12 + $0x88] sm:$0xff] }
 0x6ca   :  { %v1514_v17 = vpop.f32.mrf.mxu3  ;;  %v1577_v18 = vpop.f32.mrf.mxu2 }
 0x6cb   :  { %v1578_v29 = vadd.f32 %v1577_v18, %v1195_v27 }
 0x6cc   :  { %v1525_v19 = vpop.f32.mrf.mxu1  ;;  %v1553_v20 = vpop.f32.mrf.mxu0 }
 0x6cd   :  { %v1526_v22 = vadd.f32 %v1525_v19, %v1193_v21 }
 0x6d2   :  { %v1538_v23 = vpop.f32.mrf.mxu3  ;;  %v1579_v24 = vpop.f32.mrf.mxu2 }
 0x6d3   :  { %v3605_v25 = vadd.f32 %v1538_v23, %v1526_v22 }
 0x6d4   :  { %v1527_v26 = vpop.f32.mrf.mxu1 }
 0x6d5   :  { %v1596_v17 = vmax.f32 %v3605_v25, 0.0  ;;  %v2740_v25 = vld [vmem:[%s3750_s12 + $0x80] sm:$0xff] }
 0x6da   :  { %v1540_v28 = vpop.f32.mrf.mxu3 }
 0x6db   :  { %v2751_v28 = vld [vmem:[%s3753_s14 + $0x58] sm:$0xff] }
 0x6dc   :  { %v1590_v30 = vpop.f32.mrf.mxu1  ;;  %1932 = vmatpush.bf16.msra.mxu0 %v2751_v28 }
 0x6dd   :  { %v1591_v31 = vadd.f32 %v1590_v30, %v1578_v29  ;;  %v2750_v29 = vld [vmem:[%s3753_s14 + $0x50] sm:$0xff]  ;;  %v2767_v30 = vld [vmem:[%s3751_s11 + $0x2] ss:$0 sm:$0xff] }
 0x6df   :  { %v1598_v32 = vsel %vm215_vm2, %v1591_v31, -inf }
 0x6e0   :  { %1599 = vmax.xlane.f32.xlu2 %v1598_v32  ;;  %1933 = vmatpush.bf16.msra.mxu0 %v2750_v29 }
 0x6e2   :  { %v1564_v34 = vpop.f32.mrf.mxu3 }
 0x6e3   :  { %v3608_v16 = vadd.f32 %v1564_v34, %v1552_v33 }
 0x6e4   :  { %v1592_v35 = vpop.f32.mrf.mxu1 }
 0x6e5   :  { %v1597_v21 = vmax.f32 %v3608_v16, 0.0  ;;  %v2749_v16 = vld [vmem:[%s3753_s14 + $0x48] sm:$0xff]  ;;  %v2748_v35 = vld [vmem:[%s3753_s14 + $0x40] sm:$0xff] }
 0x6e6   :  { %1934 = vmatpush.bf16.msra.mxu0 %v2749_v16 }
 0x6ea   :  { %v1566_v36 = vpop.f32.mrf.mxu3  ;;  %1935 = vmatpush.bf16.msra.mxu0 %v2748_v35 }
 0x6eb   :  { %v2625_v36 = vld [vmem:[%s3756_s16 + $0x58] sm:$0xff] }
 0x6ec   :  { %1967 = vmatpush.msrb.mxu1 %v2625_v36 }
 0x6f8   :  { %726 = vrot.lane.b32.xlu2 %v3214_v62, %s2798_s4  ;;  %v990_v62 = vsub.f32 0.0, %v988_v42 }
 0x6fa   :  { %v991_v47 = vmul.f32 1.442695, %v990_v62  ;;  %v2623_v62 = vld [vmem:[%s3756_s16 + $0x48] sm:$0xff] }
 0x753   :  { %v1600_v37 = vpop.xlane.xlu2 %1599 }
 0x754   :  { %v1601_v38 = vsub.f32 %v1591_v31, %v1600_v37  ;;  %v2624_v37 = vld [vmem:[%s3756_s16 + $0x50] sm:$0xff] }
 0x755   :  { %1968 = vmatpush.msrb.mxu1 %v2624_v37 }
 0x756   :  { %v1602_v40 = vmul.f32 1.442695, %v1601_v38  ;;  %v2768_v38 = vld [vmem:[%s3752_s13 + $0x2] ss:$0 sm:$0xff] }
 0x757   :  { %1969 = vmatpush.msrb.mxu1 %v2623_v62 }
 0x758   :  { %2783 = vpow2.f32 %v1602_v40 }
 0x759   :  { %2785 = vpow2.f32 %v991_v47 }
 0x75b   :  { %v727_v44 = vpop.permute.xlu2 %726 }
 0x75c   :  { %730 = vst.msk [vmem:[%s3754_s19 + $0x8] sm:$0xff] %vm729_vm8, %v727_v44 }
 0x75e   :  { %v2784_v45 = vpop.eup %2783 }
 0x75f   :  { %v1604_v46 = vsel %vm215_vm2, %v2784_v45, 0.0  ;;  %v2786_v48 = vpop.eup %2785 }
 0x760   :  { %1605 = vadd.xlane.f32.xlu1 %v1604_v46  ;;  %v993_v49 = vadd.f32 1.0, %v2786_v48  ;;  %v2769_v46 = vld [vmem:[%s3755_s15 + $0x2] ss:$0 sm:$0xff] }
 0x762   :  { %2787 = vrcp.f32 %v993_v49 }
 0x768   :  { %v2788_v41 = vpop.eup %2787 }
 0x779   :  { %1003 = vrot.lane.b32.xlu1 %v2788_v41, %s2798_s4 }
 0x7d3   :  { %v1606_v55 = vpop.xlane.xlu1 %1605 }
 0x7d4   :  { %2789 = vrcp.f32 %v1606_v55 }
 0x7da   :  { %v2790_v56 = vpop.eup %2789 }
 0x7db   :  { %v1608_v8 = vmul.f32 %v2790_v56, %v2784_v45  ;;  %v2622_v45 = vld [vmem:[%s3756_s16 + $0x40] sm:$0xff] }
 0x7dc   :  { %1970 = vmatpush.msrb.mxu1 %v2622_v45 }
 0x7dd   :  { %2490 = vmatmul.msk.f32.vlgmr.msrb.gmra.mxu3 %vm215_vm2, %v1608_v8  ;;  %2494 = vmatmul.msk.f32.vlgmr.msrb.gmra.mxu0 %vm215_vm2, %v1608_v8 }
 0x7de   :  { %2496 = vmatmul.msk.f32.vlgmr.msra.gmra.mxu1 %vm215_vm2, %v1608_v8  ;;  %1872 = vmatpush.bf16.msrb.mxu3 %v2747_v1 }
 0x7e2   :  { %1873 = vmatpush.bf16.msrb.mxu3 %v2746_v2 }
 0x7e5   :  { %2492 = vmatmul.msk.f32.vlgmr.msra.gmra.mxu3 %vm215_vm2, %v1608_v8 }
 0x7e6   :  { %1874 = vmatpush.bf16.msrb.mxu3 %v2745_v3 }
 0x7ea   :  { %1875 = vmatpush.bf16.msrb.mxu3 %v2744_v4 }
 0x7eb   :  { %v1004_v57 = vpop.permute.xlu1 %1003 }
 0x7ec   :  { %2277 = vst.msk [vmem:[%s3754_s19 + $0x18] sm:$0xff] %vm729_vm8, %v1004_v57 }
 0x7ee   :  { %1876 = vmatpush.bf16.msrb.mxu3 %v2743_v6 }
 0x7f2   :  { %1877 = vmatpush.bf16.msrb.mxu3 %v2742_v9 }
 0x7f6   :  { %1878 = vmatpush.bf16.msrb.mxu3 %v2741_v12 }
 0x7fa   :  { %1879 = vmatpush.bf16.msrb.mxu3 %v2740_v25 }
 0x85a   :  { %v1684_v13 = vpop.f32.mrf.mxu0 }
 0x85b   :  { %v1704_v20 = vpop.f32.mrf.mxu1  ;;  %v1709_v22 = vmul.f32 %v1684_v13, %v1596_v17 }
 0x85c   :  { %v1710_v24 = vmul.f32 %v1704_v20, %v1597_v21 }
 0x860   :  { %v1644_v5 = vpop.f32.mrf.mxu3 }
 0x861   :  { %v1707_v18 = vmul.f32 %v1644_v5, %v1594_v10 }
 0x868   :  { %v1664_v15 = vpop.f32.mrf.mxu3 }
 0x869   :  { %v1708_v19 = vmul.f32 %v1664_v15, %v1595_v11 }
 0x86b   :  { %v1711_v23 = vadd.f32 %v1708_v19, %v1707_v18 }
 0x86d   :  { %v1712_v26 = vadd.f32 %v1711_v23, %v1709_v22 }
 0x86f   :  { %v1713_v27 = vadd.f32 %v1712_v26, %v1710_v24 }
 0x871   :  { %2497 = vst [vmem:[%s3749_s18 + $0x10] sm:$0xff] %v1713_v27  ;;  %v1716_v7 = vpack.c.bf16 %v1713_v27, %v1713_v27 }
 0x873   :  { %1795 = vmatmul.bf16.vlgmr.msrb.gmra.mxu2 %v1716_v7 }
 0x8f6   :  { %v1796_v14 = vpop.f32.mrf.mxu2 }
 0x8f7   :  { %v1797_v31 = vadd.f32 %v2767_v30, %v1796_v14 }
 0x8f9   :  { %v1800_v32 = vmax.f32 %v1797_v31, 0.0 }
 0x8fb   :  { %v1801_v33 = vpack.c.bf16 %v1800_v32, %v1800_v32  ;;  %2628 = vst [vmem:[%s3754_s19 + $0x20] sm:$0xff] %v1800_v32 }
 0x8fd   :  { %1880 = vmatmul.bf16.vlgmr.msrb.gmra.mxu3 %v1801_v33 }
 0x8fe   :  { %v1798_v34 = vpop.f32.mrf.mxu2 }
 0x980   :  { %v1881_v39 = vpop.f32.mrf.mxu3 }
 0x981   :  { %v1882_v40 = vadd.f32 %v2768_v38, %v1881_v39 }
 0x983   :  { %v1885_v42 = vmax.f32 %v1882_v40, 0.0 }
 0x985   :  { %v1886_v43 = vpack.c.bf16 %v1885_v42, %v1885_v42  ;;  %2629 = vst.msk [vmem:[%s3754_s19 + $0x28] sm:$0xff] %vm664_vm4, %v1885_v42 }
 0x987   :  { %2621 = vmatmul.msk.bf16.vlgmr.msra.gmra.mxu0 %vm664_vm4, %v1886_v43 }
 0x988   :  { %v1883_v44 = vpop.f32.mrf.mxu3 }
 0xa04   :  { %v1937_v47 = vpop.f32.mrf.mxu0 }
 0xa05   :  { %v1938_v48 = vadd.f32 %v2769_v46, %v1937_v47 }
 0xa07   :  { %v1941_v49 = vmax.f32 %v1938_v48, 0.0 }
 0xa09   :  { %1983 = vrot.lane.b32.xlu0 %v1941_v49, %s2797_s21  ;;  %2627 = vmatmul.msk.f32.vlgmr.msrb.gmra.mxu1 %vm142_vm0, %v1941_v49 }
 0xa0c   :  { %v1939_v41 = vpop.f32.mrf.mxu0 }
 0xa7b   :  { %v1984_v50 = vpop.permute.xlu0 %1983 }
 0xa7c   :  { %2630 = vst.msk [vmem:[%s3754_s19 + $0x28] sm:$0xff] %vm723_vm7, %v1984_v50 }
 0xa86   :  { %v1972_v52 = vpop.f32.mrf.mxu1 }
 0xa87   :  { %v1973_v53 = vadd.f32 %v2770_v51, %v1972_v52 }
 0xa89   :  { %v1975_v54 = vsub.f32 0.0, %v1973_v53 }
 0xa8b   :  { %v1976_v55 = vmul.f32 1.442695, %v1975_v54 }
 0xa8d   :  { %2791 = vpow2.f32 %v1976_v55 }
 0xa93   :  { %v2792_v56 = vpop.eup %2791 }
 0xa94   :  { %v1978_v8 = vadd.f32 1.0, %v2792_v56 }
 0xa96   :  { %2793 = vrcp.f32 %v1978_v8 }
 0xa9c   :  { %v2794_v57 = vpop.eup %2793 }
 0xa9d   :  { %1988 = vrot.lane.b32.xlu0 %v2794_v57, %s2798_s4 }
 0xb0f   :  { %v1989_v58 = vpop.permute.xlu0 %1988 }
 0xb10   :  { %2631 = vst.msk [vmem:[%s3754_s19 + $0x28] sm:$0xff] %vm729_vm8, %v1989_v58 }

</bundles_post_ra>
